<compile_context>
chip_gen: v7x
topology: tpu7x:2x2x1
jax: 0.10.0
libtpu: 0.0.40
codegen_flags: <defaults>
</compile_context>

<pallas_src>
import math

import jax
import jax.numpy as jnp
from jax.experimental import pallas as pl
from jax.experimental.pallas import tpu as pltpu  # noqa: F401  (no grid / manual DMA needed at toy size)

# ----- scaled-down config mirroring the module structure -----
B = 2            # batch
SEQ = 8          # transformer sequence length  (= Whisper hidden axis; 768 in real model)
C_FEAT = 64      # per-token feature dim        (= feat_seq frames;    1500 in real model)
D = 32           # dim_transformer              (256 real)
NHEAD = 2        # nhead_transformer            (4 real)
DH = D // NHEAD
NLAYERS = 2      # nlayers_transformer          (4 real)
DFF = 2 * D      # transformer FFN hidden       (2048 default in real model)
EPS = 1e-5       # BatchNorm1d / LayerNorm eps (PyTorch defaults)

PACKED_ORDER = ("bn_gb", "emb_w", "w_qkv", "w_o", "lvecs",
                "w_ffn1", "w_ffn2", "pw1", "head_vecs")


# --------------------------------------------------------------------------
# Kernel: BN prologue + transformer encoder + PoolAttFF + sigmoid, whole batch
# --------------------------------------------------------------------------
def _layer_norm(v, g, b):
    mu = jnp.mean(v, axis=-1, keepdims=True)
    var = jnp.mean((v - mu) ** 2, axis=-1, keepdims=True)
    return (v - mu) * jax.lax.rsqrt(var + EPS) * g + b


def model_kernel(x_ref, bn_ref, emb_w_ref, wqkv_ref, wo_ref, lvec_ref,
                 w1_ref, w2_ref, pw1_ref, hv_ref, o_ref):
    G = NHEAD * B                                      # batched-attention group count

    # ---- BatchNorm1d prologue: per-channel batch stats over (batch, seq) ----
    x = x_ref[...].reshape(B * SEQ, C_FEAT)
    mean = jnp.mean(x, axis=0, keepdims=True)
    var = jnp.mean((x - mean) ** 2, axis=0, keepdims=True)
    bn = bn_ref[...]                                   # [2, C_FEAT] (gamma; beta)
    x = (x - mean) * jax.lax.rsqrt(var + EPS) * bn[0:1, :] + bn[1:2, :]

    hv = hv_ref[...]                                   # [4, 2D] packed misc/head vectors
    emb_b = hv[0:1, 0:D]

    # ---- TransformerWrapper: linear embedding + post-norm encoder layers ----
    h = jnp.dot(x, emb_w_ref[...], preferred_element_type=jnp.float32) + emb_b   # [B*SEQ, D]

    scale = 1.0 / math.sqrt(DH)
    for l in range(NLAYERS):
        lv = lvec_ref[l]                               # [4, 3D] packed per-layer vectors
        b_qkv = lv[0:1, :]
        bo    = lv[1:2, 0 * D:1 * D]
        ln1_g = lv[1:2, 1 * D:2 * D]
        ln1_b = lv[1:2, 2 * D:3 * D]
        ln2_g = lv[2:3, 0 * D:1 * D]
        ln2_b = lv[2:3, 1 * D:2 * D]
        b2    = lv[2:3, 2 * D:3 * D]
        b1    = lv[3:4, 0:DFF]

        # fused QKV projection: one [B*SEQ, D] @ [D, 3D] MXU op (96 output lanes)
        qkv = jnp.dot(h, wqkv_ref[l], preferred_element_type=jnp.float32) + b_qkv  # [B*SEQ, 3D]

        # relayout to [(head, batch), SEQ, DH] blocks (pure data movement, no compute)
        blocks = jnp.stack(
            [qkv[:, i * DH:(i + 1) * DH].reshape(B, SEQ, DH) for i in range(3 * NHEAD)],
            axis=0,
        ).reshape(3 * NHEAD * B, SEQ, DH)
        q = blocks[0 * G:1 * G]                        # [G, SEQ, DH]
        k = blocks[1 * G:2 * G]
        v = blocks[2 * G:3 * G]

        # head/batch-batched attention (no per-head Python loop over tiny matmuls)
        s = jnp.einsum('gqd,gkd->gqk', q, k, preferred_element_type=jnp.float32) * scale
        s = s - jnp.max(s, axis=-1, keepdims=True)
        e = jnp.exp(s)
        p = e * pl.reciprocal(jnp.sum(e, axis=-1, keepdims=True), approx=True)
        o = jnp.einsum('gqk,gkd->gqd', p, v, preferred_element_type=jnp.float32)   # [G, SEQ, DH]

        # concat(heads) @ Wo  ==  sum_h (o_h @ Wo[rows of head h])  -- batched over heads
        oh = o.reshape(NHEAD, B * SEQ, DH)
        wo_h = wo_ref[l].reshape(NHEAD, DH, D)
        att = jnp.einsum('hrd,hde->hre', oh, wo_h, preferred_element_type=jnp.float32)
        att = jnp.sum(att, axis=0) + bo                                             # [B*SEQ, D]

        h = _layer_norm(h + att, ln1_g, ln1_b)
        ff = jnp.maximum(
            jnp.dot(h, w1_ref[l], preferred_element_type=jnp.float32) + b1, 0.0)
        ff = jnp.dot(ff, w2_ref[l], preferred_element_type=jnp.float32) + b2
        h = _layer_norm(h + ff, ln2_g, ln2_b)

    # ---- PoolAttFF (Dropout -> identity at inference) ----
    pb1     = hv[1:2, :]
    pw2_row = hv[2:3, :]
    pw3_row = hv[3:4, 0:D]
    pb2     = hv[3:4, D:D + 1]
    pb3     = hv[3:4, D + 1:D + 2]

    a = jnp.maximum(
        jnp.dot(h, pw1_ref[...], preferred_element_type=jnp.float32) + pb1, 0.0)    # [B*SEQ, 2D]
    att_logit = jnp.sum(a * pw2_row, axis=-1, keepdims=True) + pb2                  # [B*SEQ, 1]

    att3 = att_logit.reshape(B, SEQ, 1)                                              # softmax over time
    att3 = att3 - jnp.max(att3, axis=1, keepdims=True)
    e = jnp.exp(att3)
    att3 = e * pl.reciprocal(jnp.sum(e, axis=1, keepdims=True), approx=True)
    pooled = jnp.sum(att3 * h.reshape(B, SEQ, D), axis=1)                            # [B, D]

    z = jnp.sum(pooled * pw3_row, axis=-1, keepdims=True) + pb3                      # [B, 1]
    o_ref[...] = pl.reciprocal(1.0 + jnp.exp(-z), approx=True)                       # sigmoid


# --------------------------------------------------------------------------
# Parameters (deterministic synthetic init, packed into a few resident slabs)
# --------------------------------------------------------------------------
def init_params(key):
    keys = iter(jax.random.split(key, 32))

    def w(shape, scale=0.05):
        return (scale * jax.random.normal(next(keys), shape)).astype(jnp.float32)

    # ----- logical parameters (mirroring the PyTorch module structure) -----
    bn_gamma = w((C_FEAT,)) + 1.0
    bn_beta = w((C_FEAT,))
    emb_w = w((C_FEAT, D))
    emb_b = w((D,))
    wq = w((NLAYERS, D, D)); bq = w((NLAYERS, D))
    wk = w((NLAYERS, D, D)); bk = w((NLAYERS, D))
    wv = w((NLAYERS, D, D)); bv = w((NLAYERS, D))
    wo = w((NLAYERS, D, D)); bo = w((NLAYERS, D))
    ln1_g = jnp.ones((NLAYERS, D), jnp.float32); ln1_b = jnp.zeros((NLAYERS, D), jnp.float32)
    ln2_g = jnp.ones((NLAYERS, D), jnp.float32); ln2_b = jnp.zeros((NLAYERS, D), jnp.float32)
    w1 = w((NLAYERS, D, DFF)); b1 = w((NLAYERS, DFF))
    w2 = w((NLAYERS, DFF, D)); b2 = w((NLAYERS, D))
    pw1 = w((D, 2 * D)); pb1 = w((2 * D,))
    pw2 = w((2 * D,));   pb2 = w(())
    pw3 = w((D,));       pb3 = w(())

    # ----- pack into a few slabs (fewer DMA descriptors / less (8,128) tile padding) -----
    def zL(n):
        return jnp.zeros((NLAYERS, n), jnp.float32)

    return {
        "bn_gb": jnp.stack([bn_gamma, bn_beta], axis=0),                     # [2, C_FEAT]
        "emb_w": emb_w,                                                      # [C_FEAT, D]
        "w_qkv": jnp.concatenate([wq, wk, wv], axis=-1),                     # [L, D, 3D]
        "w_o": wo,                                                           # [L, D, D]
        "lvecs": jnp.stack([                                                 # [L, 4, 3D]
            jnp.concatenate([bq, bk, bv], axis=-1),
            jnp.concatenate([bo, ln1_g, ln1_b], axis=-1),
            jnp.concatenate([ln2_g, ln2_b, b2], axis=-1),
            jnp.concatenate([b1, zL(3 * D - DFF)], axis=-1),
        ], axis=1),
        "w_ffn1": w1,                                                        # [L, D, DFF]
        "w_ffn2": w2,                                                        # [L, DFF, D]
        "pw1": pw1,                                                          # [D, 2D]
        "head_vecs": jnp.stack([                                             # [4, 2D]
            jnp.concatenate([emb_b, jnp.zeros((D,), jnp.float32)]),
            pb1,
            pw2,
            jnp.concatenate([pw3, pb2[None], pb3[None],
                             jnp.zeros((2 * D - D - 2,), jnp.float32)]),
        ], axis=0),
    }


# --------------------------------------------------------------------------
# Forward wrapper (permute glue in plain JAX, everything else in one kernel)
# --------------------------------------------------------------------------
def forward(whisper_feats, params):
    # out_feats = self.feat_extract(x)            -> [B, frames, hidden]  (synthetic stand-in)
    # out_feats = out_feats.permute(0, 2, 1)      -> [B, hidden, frames] = [B, SEQ, C_FEAT]
    feats = jnp.transpose(whisper_feats, (0, 2, 1))
    # norm_input(permute).permute round-trip == per-channel BN over (batch, SEQ); it is
    # fused into the kernel prologue (no separate pallas_call / HBM round-trip).
    args = (feats,) + tuple(params[k] for k in PACKED_ORDER)
    return pl.pallas_call(
        model_kernel,
        out_shape=jax.ShapeDtypeStruct((B, 1), jnp.float32),
        # No grid: the whole (tiny) batch runs in one invocation on one TensorCore.
        # TODO(synk): at real sizes (SEQ=768, D=256, 4 layers) reintroduce a batch/layer
        #             grid, bf16 matmul operands, and an explicit vmem_limit_bytes.
    )(*args)


if __name__ == "__main__":
    key = jax.random.PRNGKey(0)
    pkey, xkey = jax.random.split(key)
    params = init_params(pkey)
    # Synthetic stand-in for the (frozen, untranslated) Whisper encoder output:
    # [B, frames (=C_FEAT), hidden (=SEQ)].
    x = jax.random.normal(xkey, (B, C_FEAT, SEQ), dtype=jnp.float32)

    out = jax.block_until_ready(forward(x, params))

    assert out.shape == (B, 1), out.shape
    assert bool(jnp.all(jnp.isfinite(out)))
    assert bool(jnp.all((out > 0.0) & (out < 1.0)))   # sigmoid range
    print("KERNEL_OK")
</pallas_src>

<mosaic_0001>
module attributes {stable_mosaic.version = 11 : i64} {
  func.func @model_kernel(%arg0: memref<2x8x64xf32, #tpu.memory_space<vmem>>, %arg1: memref<2x64xf32, #tpu.memory_space<vmem>>, %arg2: memref<64x32xf32, #tpu.memory_space<vmem>>, %arg3: memref<2x32x96xf32, #tpu.memory_space<vmem>>, %arg4: memref<2x32x32xf32, #tpu.memory_space<vmem>>, %arg5: memref<2x4x96xf32, #tpu.memory_space<vmem>>, %arg6: memref<2x32x64xf32, #tpu.memory_space<vmem>>, %arg7: memref<2x64x32xf32, #tpu.memory_space<vmem>>, %arg8: memref<32x64xf32, #tpu.memory_space<vmem>>, %arg9: memref<4x64xf32, #tpu.memory_space<vmem>>, %arg10: memref<2x1xf32, #tpu.memory_space<vmem>>) attributes {dimension_semantics = [], scalar_prefetch = 0 : i64, scratch_operands = 0 : i64, tpu.core_type = #tpu.core_type<tc>} {
    %c0 = arith.constant 0 : index
    %c0_0 = arith.constant 0 : index
    %c0_1 = arith.constant 0 : index
    %0 = vector.load %arg0[%c0, %c0_0, %c0_1] : memref<2x8x64xf32, #tpu.memory_space<vmem>>, vector<2x8x64xf32>
    %1 = vector.shape_cast %0 : vector<2x8x64xf32> to vector<16x64xf32>
    %cst = arith.constant dense<0.000000e+00> : vector<64xf32>
    %2 = vector.multi_reduction <add>, %1, %cst [0] : vector<16x64xf32> to vector<64xf32>
    %3 = vector.shape_cast %2 : vector<64xf32> to vector<1x64xf32>
    %cst_2 = arith.constant 1.600000e+01 : f32
    %4 = vector.broadcast %cst_2 : f32 to vector<1x64xf32>
    %5 = arith.divf %3, %4 : vector<1x64xf32>
    %6 = vector.broadcast %5 : vector<1x64xf32> to vector<16x64xf32>
    %7 = arith.subf %1, %6 : vector<16x64xf32>
    %8 = arith.mulf %7, %7 : vector<16x64xf32>
    %cst_3 = arith.constant dense<0.000000e+00> : vector<64xf32>
    %9 = vector.multi_reduction <add>, %8, %cst_3 [0] : vector<16x64xf32> to vector<64xf32>
    %10 = vector.shape_cast %9 : vector<64xf32> to vector<1x64xf32>
    %cst_4 = arith.constant 1.600000e+01 : f32
    %11 = vector.broadcast %cst_4 : f32 to vector<1x64xf32>
    %12 = arith.divf %10, %11 : vector<1x64xf32>
    %c0_5 = arith.constant 0 : index
    %c0_6 = arith.constant 0 : index
    %13 = vector.load %arg1[%c0_5, %c0_6] : memref<2x64xf32, #tpu.memory_space<vmem>>, vector<2x64xf32>
    %14 = vector.broadcast %5 : vector<1x64xf32> to vector<16x64xf32>
    %15 = arith.subf %1, %14 : vector<16x64xf32>
    %cst_7 = arith.constant 9.99999974E-6 : f32
    %16 = vector.broadcast %cst_7 : f32 to vector<1x64xf32>
    %17 = arith.addf %12, %16 : vector<1x64xf32>
    %18 = math.rsqrt %17 : vector<1x64xf32>
    %19 = vector.broadcast %18 : vector<1x64xf32> to vector<16x64xf32>
    %20 = arith.mulf %15, %19 : vector<16x64xf32>
    %21 = vector.extract_strided_slice %13 {offsets = [0, 0], sizes = [1, 64], strides = [1, 1]} : vector<2x64xf32> to vector<1x64xf32>
    %22 = vector.broadcast %21 : vector<1x64xf32> to vector<16x64xf32>
    %23 = arith.mulf %20, %22 : vector<16x64xf32>
    %24 = vector.extract_strided_slice %13 {offsets = [1, 0], sizes = [1, 64], strides = [1, 1]} : vector<2x64xf32> to vector<1x64xf32>
    %25 = vector.broadcast %24 : vector<1x64xf32> to vector<16x64xf32>
    %26 = arith.addf %23, %25 : vector<16x64xf32>
    %c0_8 = arith.constant 0 : index
    %c0_9 = arith.constant 0 : index
    %27 = vector.load %arg9[%c0_8, %c0_9] : memref<4x64xf32, #tpu.memory_space<vmem>>, vector<4x64xf32>
    %28 = vector.extract_strided_slice %27 {offsets = [0, 0], sizes = [1, 32], strides = [1, 1]} : vector<4x64xf32> to vector<1x32xf32>
    %c0_10 = arith.constant 0 : index
    %c0_11 = arith.constant 0 : index
    %29 = vector.load %arg2[%c0_10, %c0_11] : memref<64x32xf32, #tpu.memory_space<vmem>>, vector<64x32xf32>
    %cst_12 = arith.constant dense<0.000000e+00> : vector<16x32xf32>
    %30 = tpu.matmul %26, %29, %cst_12 {dimension_numbers = #tpu.dot_dimension_numbers<[1], [0], [0], [1], [0, 0, 1, 1], [], []>} : vector<16x64xf32>, vector<64x32xf32>, vector<16x32xf32> -> vector<16x32xf32>
    %31 = vector.broadcast %28 : vector<1x32xf32> to vector<16x32xf32>
    %32 = arith.addf %30, %31 : vector<16x32xf32>
    %c0_13 = arith.constant 0 : index
    %c0_14 = arith.constant 0 : index
    %c0_15 = arith.constant 0 : index
    %33 = vector.load %arg5[%c0_13, %c0_14, %c0_15] : memref<2x4x96xf32, #tpu.memory_space<vmem>>, vector<1x4x96xf32>
    %34 = vector.shape_cast %33 : vector<1x4x96xf32> to vector<4x96xf32>
    %35 = vector.extract_strided_slice %34 {offsets = [0, 0], sizes = [1, 96], strides = [1, 1]} : vector<4x96xf32> to vector<1x96xf32>
    %36 = vector.extract_strided_slice %34 {offsets = [1, 0], sizes = [1, 32], strides = [1, 1]} : vector<4x96xf32> to vector<1x32xf32>
    %37 = vector.extract_strided_slice %34 {offsets = [1, 32], sizes = [1, 32], strides = [1, 1]} : vector<4x96xf32> to vector<1x32xf32>
    %38 = vector.extract_strided_slice %34 {offsets = [1, 64], sizes = [1, 32], strides = [1, 1]} : vector<4x96xf32> to vector<1x32xf32>
    %39 = vector.extract_strided_slice %34 {offsets = [2, 0], sizes = [1, 32], strides = [1, 1]} : vector<4x96xf32> to vector<1x32xf32>
    %40 = vector.extract_strided_slice %34 {offsets = [2, 32], sizes = [1, 32], strides = [1, 1]} : vector<4x96xf32> to vector<1x32xf32>
    %41 = vector.extract_strided_slice %34 {offsets = [2, 64], sizes = [1, 32], strides = [1, 1]} : vector<4x96xf32> to vector<1x32xf32>
    %42 = vector.extract_strided_slice %34 {offsets = [3, 0], sizes = [1, 64], strides = [1, 1]} : vector<4x96xf32> to vector<1x64xf32>
    %c0_16 = arith.constant 0 : index
    %c0_17 = arith.constant 0 : index
    %c0_18 = arith.constant 0 : index
    %43 = vector.load %arg3[%c0_16, %c0_17, %c0_18] : memref<2x32x96xf32, #tpu.memory_space<vmem>>, vector<1x32x96xf32>
    %44 = vector.shape_cast %43 : vector<1x32x96xf32> to vector<32x96xf32>
    %cst_19 = arith.constant dense<0.000000e+00> : vector<16x96xf32>
    %45 = tpu.matmul %32, %44, %cst_19 {dimension_numbers = #tpu.dot_dimension_numbers<[1], [0], [0], [1], [0, 0, 1, 1], [], []>} : vector<16x32xf32>, vector<32x96xf32>, vector<16x96xf32> -> vector<16x96xf32>
    %46 = vector.broadcast %35 : vector<1x96xf32> to vector<16x96xf32>
    %47 = arith.addf %45, %46 : vector<16x96xf32>
    %48 = vector.extract_strided_slice %47 {offsets = [0, 0], sizes = [16, 16], strides = [1, 1]} : vector<16x96xf32> to vector<16x16xf32>
    %49 = vector.shape_cast %48 : vector<16x16xf32> to vector<2x8x16xf32>
    %50 = vector.extract_strided_slice %47 {offsets = [0, 16], sizes = [16, 16], strides = [1, 1]} : vector<16x96xf32> to vector<16x16xf32>
    %51 = vector.shape_cast %50 : vector<16x16xf32> to vector<2x8x16xf32>
    %52 = vector.extract_strided_slice %47 {offsets = [0, 32], sizes = [16, 16], strides = [1, 1]} : vector<16x96xf32> to vector<16x16xf32>
    %53 = vector.shape_cast %52 : vector<16x16xf32> to vector<2x8x16xf32>
    %54 = vector.extract_strided_slice %47 {offsets = [0, 48], sizes = [16, 16], strides = [1, 1]} : vector<16x96xf32> to vector<16x16xf32>
    %55 = vector.shape_cast %54 : vector<16x16xf32> to vector<2x8x16xf32>
    %56 = vector.extract_strided_slice %47 {offsets = [0, 64], sizes = [16, 16], strides = [1, 1]} : vector<16x96xf32> to vector<16x16xf32>
    %57 = vector.shape_cast %56 : vector<16x16xf32> to vector<2x8x16xf32>
    %58 = vector.extract_strided_slice %47 {offsets = [0, 80], sizes = [16, 16], strides = [1, 1]} : vector<16x96xf32> to vector<16x16xf32>
    %59 = vector.shape_cast %58 : vector<16x16xf32> to vector<2x8x16xf32>
    %60 = vector.shape_cast %49 : vector<2x8x16xf32> to vector<1x2x8x16xf32>
    %61 = vector.shape_cast %51 : vector<2x8x16xf32> to vector<1x2x8x16xf32>
    %62 = vector.shape_cast %53 : vector<2x8x16xf32> to vector<1x2x8x16xf32>
    %63 = vector.shape_cast %55 : vector<2x8x16xf32> to vector<1x2x8x16xf32>
    %64 = vector.shape_cast %57 : vector<2x8x16xf32> to vector<1x2x8x16xf32>
    %65 = vector.shape_cast %59 : vector<2x8x16xf32> to vector<1x2x8x16xf32>
    %66 = tpu.concatenate %60, %61, %62, %63, %64, %65 in 0 : vector<1x2x8x16xf32>, vector<1x2x8x16xf32>, vector<1x2x8x16xf32>, vector<1x2x8x16xf32>, vector<1x2x8x16xf32>, vector<1x2x8x16xf32> -> vector<6x2x8x16xf32>
    %67 = vector.shape_cast %66 : vector<6x2x8x16xf32> to vector<12x8x16xf32>
    %68 = vector.extract_strided_slice %67 {offsets = [0, 0, 0], sizes = [4, 8, 16], strides = [1, 1, 1]} : vector<12x8x16xf32> to vector<4x8x16xf32>
    %69 = vector.extract_strided_slice %67 {offsets = [4, 0, 0], sizes = [4, 8, 16], strides = [1, 1, 1]} : vector<12x8x16xf32> to vector<4x8x16xf32>
    %70 = vector.extract_strided_slice %67 {offsets = [8, 0, 0], sizes = [4, 8, 16], strides = [1, 1, 1]} : vector<12x8x16xf32> to vector<4x8x16xf32>
    "tpu.trace_start"() <{level = 10 : i32, message = "gqd,gkd->gqk"}> : () -> ()
    %cst_20 = arith.constant dense<0.000000e+00> : vector<4x8x8xf32>
    %71 = tpu.matmul %68, %69, %cst_20 {dimension_numbers = #tpu.dot_dimension_numbers<[2], [2], [1], [1], [0, 0, 0, 1, 1, 1], [0], [0]>} : vector<4x8x16xf32>, vector<4x8x16xf32>, vector<4x8x8xf32> -> vector<4x8x8xf32>
    "tpu.trace_stop"() : () -> ()
    %cst_21 = arith.constant 2.500000e-01 : f32
    %72 = vector.broadcast %cst_21 : f32 to vector<4x8x8xf32>
    %73 = arith.mulf %71, %72 : vector<4x8x8xf32>
    %cst_22 = arith.constant dense<0xFF800000> : vector<4x8xf32>
    %74 = vector.multi_reduction <maximumf>, %73, %cst_22 [2] : vector<4x8x8xf32> to vector<4x8xf32>
    %75 = vector.shape_cast %74 : vector<4x8xf32> to vector<4x8x1xf32>
    %76 = vector.broadcast %75 : vector<4x8x1xf32> to vector<4x8x8xf32>
    %77 = arith.subf %73, %76 : vector<4x8x8xf32>
    %78 = math.exp %77 : vector<4x8x8xf32>
    %cst_23 = arith.constant dense<0.000000e+00> : vector<4x8xf32>
    %79 = vector.multi_reduction <add>, %78, %cst_23 [2] : vector<4x8x8xf32> to vector<4x8xf32>
    %80 = vector.shape_cast %79 : vector<4x8xf32> to vector<4x8x1xf32>
    %81 = tpu.reciprocal %80 {approx = true} : vector<4x8x1xf32> -> vector<4x8x1xf32>
    %82 = vector.broadcast %81 : vector<4x8x1xf32> to vector<4x8x8xf32>
    %83 = arith.mulf %78, %82 : vector<4x8x8xf32>
    "tpu.trace_start"() <{level = 10 : i32, message = "gqk,gkd->gqd"}> : () -> ()
    %cst_24 = arith.constant dense<0.000000e+00> : vector<4x8x16xf32>
    %84 = tpu.matmul %83, %70, %cst_24 {dimension_numbers = #tpu.dot_dimension_numbers<[2], [1], [1], [2], [0, 0, 0, 1, 1, 2], [0], [0]>} : vector<4x8x8xf32>, vector<4x8x16xf32>, vector<4x8x16xf32> -> vector<4x8x16xf32>
    "tpu.trace_stop"() : () -> ()
    %85 = vector.shape_cast %84 : vector<4x8x16xf32> to vector<2x16x16xf32>
    %c0_25 = arith.constant 0 : index
    %c0_26 = arith.constant 0 : index
    %c0_27 = arith.constant 0 : index
    %86 = vector.load %arg4[%c0_25, %c0_26, %c0_27] : memref<2x32x32xf32, #tpu.memory_space<vmem>>, vector<1x32x32xf32>
    %87 = vector.shape_cast %86 : vector<1x32x32xf32> to vector<32x32xf32>
    %88 = vector.shape_cast %87 : vector<32x32xf32> to vector<2x16x32xf32>
    "tpu.trace_start"() <{level = 10 : i32, message = "hrd,hde->hre"}> : () -> ()
    %cst_28 = arith.constant dense<0.000000e+00> : vector<2x16x32xf32>
    %89 = tpu.matmul %85, %88, %cst_28 {dimension_numbers = #tpu.dot_dimension_numbers<[2], [1], [1], [2], [0, 0, 0, 1, 1, 2], [0], [0]>} : vector<2x16x16xf32>, vector<2x16x32xf32>, vector<2x16x32xf32> -> vector<2x16x32xf32>
    "tpu.trace_stop"() : () -> ()
    %cst_29 = arith.constant dense<0.000000e+00> : vector<16x32xf32>
    %90 = vector.multi_reduction <add>, %89, %cst_29 [0] : vector<2x16x32xf32> to vector<16x32xf32>
    %91 = vector.broadcast %36 : vector<1x32xf32> to vector<16x32xf32>
    %92 = arith.addf %90, %91 : vector<16x32xf32>
    %93 = arith.addf %32, %92 : vector<16x32xf32>
    %cst_30 = arith.constant dense<0.000000e+00> : vector<16xf32>
    %94 = vector.multi_reduction <add>, %93, %cst_30 [1] : vector<16x32xf32> to vector<16xf32>
    %95 = vector.shape_cast %94 : vector<16xf32> to vector<16x1xf32>
    %cst_31 = arith.constant 3.200000e+01 : f32
    %96 = vector.broadcast %cst_31 : f32 to vector<16x1xf32>
    %97 = arith.divf %95, %96 : vector<16x1xf32>
    %98 = vector.broadcast %97 : vector<16x1xf32> to vector<16x32xf32>
    %99 = arith.subf %93, %98 : vector<16x32xf32>
    %100 = arith.mulf %99, %99 : vector<16x32xf32>
    %cst_32 = arith.constant dense<0.000000e+00> : vector<16xf32>
    %101 = vector.multi_reduction <add>, %100, %cst_32 [1] : vector<16x32xf32> to vector<16xf32>
    %102 = vector.shape_cast %101 : vector<16xf32> to vector<16x1xf32>
    %cst_33 = arith.constant 3.200000e+01 : f32
    %103 = vector.broadcast %cst_33 : f32 to vector<16x1xf32>
    %104 = arith.divf %102, %103 : vector<16x1xf32>
    %105 = vector.broadcast %97 : vector<16x1xf32> to vector<16x32xf32>
    %106 = arith.subf %93, %105 : vector<16x32xf32>
    %cst_34 = arith.constant 9.99999974E-6 : f32
    %107 = vector.broadcast %cst_34 : f32 to vector<16x1xf32>
    %108 = arith.addf %104, %107 : vector<16x1xf32>
    %109 = math.rsqrt %108 : vector<16x1xf32>
    %110 = vector.broadcast %109 : vector<16x1xf32> to vector<16x32xf32>
    %111 = arith.mulf %106, %110 : vector<16x32xf32>
    %112 = vector.broadcast %37 : vector<1x32xf32> to vector<16x32xf32>
    %113 = arith.mulf %111, %112 : vector<16x32xf32>
    %114 = vector.broadcast %38 : vector<1x32xf32> to vector<16x32xf32>
    %115 = arith.addf %113, %114 : vector<16x32xf32>
    %c0_35 = arith.constant 0 : index
    %c0_36 = arith.constant 0 : index
    %c0_37 = arith.constant 0 : index
    %116 = vector.load %arg6[%c0_35, %c0_36, %c0_37] : memref<2x32x64xf32, #tpu.memory_space<vmem>>, vector<1x32x64xf32>
    %117 = vector.shape_cast %116 : vector<1x32x64xf32> to vector<32x64xf32>
    %cst_38 = arith.constant dense<0.000000e+00> : vector<16x64xf32>
    %118 = tpu.matmul %115, %117, %cst_38 {dimension_numbers = #tpu.dot_dimension_numbers<[1], [0], [0], [1], [0, 0, 1, 1], [], []>} : vector<16x32xf32>, vector<32x64xf32>, vector<16x64xf32> -> vector<16x64xf32>
    %119 = vector.broadcast %42 : vector<1x64xf32> to vector<16x64xf32>
    %120 = arith.addf %118, %119 : vector<16x64xf32>
    %cst_39 = arith.constant 0.000000e+00 : f32
    %121 = vector.broadcast %cst_39 : f32 to vector<16x64xf32>
    %122 = arith.maximumf %120, %121 : vector<16x64xf32>
    %c0_40 = arith.constant 0 : index
    %c0_41 = arith.constant 0 : index
    %c0_42 = arith.constant 0 : index
    %123 = vector.load %arg7[%c0_40, %c0_41, %c0_42] : memref<2x64x32xf32, #tpu.memory_space<vmem>>, vector<1x64x32xf32>
    %124 = vector.shape_cast %123 : vector<1x64x32xf32> to vector<64x32xf32>
    %cst_43 = arith.constant dense<0.000000e+00> : vector<16x32xf32>
    %125 = tpu.matmul %122, %124, %cst_43 {dimension_numbers = #tpu.dot_dimension_numbers<[1], [0], [0], [1], [0, 0, 1, 1], [], []>} : vector<16x64xf32>, vector<64x32xf32>, vector<16x32xf32> -> vector<16x32xf32>
    %126 = vector.broadcast %41 : vector<1x32xf32> to vector<16x32xf32>
    %127 = arith.addf %125, %126 : vector<16x32xf32>
    %128 = arith.addf %115, %127 : vector<16x32xf32>
    %cst_44 = arith.constant dense<0.000000e+00> : vector<16xf32>
    %129 = vector.multi_reduction <add>, %128, %cst_44 [1] : vector<16x32xf32> to vector<16xf32>
    %130 = vector.shape_cast %129 : vector<16xf32> to vector<16x1xf32>
    %cst_45 = arith.constant 3.200000e+01 : f32
    %131 = vector.broadcast %cst_45 : f32 to vector<16x1xf32>
    %132 = arith.divf %130, %131 : vector<16x1xf32>
    %133 = vector.broadcast %132 : vector<16x1xf32> to vector<16x32xf32>
    %134 = arith.subf %128, %133 : vector<16x32xf32>
    %135 = arith.mulf %134, %134 : vector<16x32xf32>
    %cst_46 = arith.constant dense<0.000000e+00> : vector<16xf32>
    %136 = vector.multi_reduction <add>, %135, %cst_46 [1] : vector<16x32xf32> to vector<16xf32>
    %137 = vector.shape_cast %136 : vector<16xf32> to vector<16x1xf32>
    %cst_47 = arith.constant 3.200000e+01 : f32
    %138 = vector.broadcast %cst_47 : f32 to vector<16x1xf32>
    %139 = arith.divf %137, %138 : vector<16x1xf32>
    %140 = vector.broadcast %132 : vector<16x1xf32> to vector<16x32xf32>
    %141 = arith.subf %128, %140 : vector<16x32xf32>
    %cst_48 = arith.constant 9.99999974E-6 : f32
    %142 = vector.broadcast %cst_48 : f32 to vector<16x1xf32>
    %143 = arith.addf %139, %142 : vector<16x1xf32>
    %144 = math.rsqrt %143 : vector<16x1xf32>
    %145 = vector.broadcast %144 : vector<16x1xf32> to vector<16x32xf32>
    %146 = arith.mulf %141, %145 : vector<16x32xf32>
    %147 = vector.broadcast %39 : vector<1x32xf32> to vector<16x32xf32>
    %148 = arith.mulf %146, %147 : vector<16x32xf32>
    %149 = vector.broadcast %40 : vector<1x32xf32> to vector<16x32xf32>
    %150 = arith.addf %148, %149 : vector<16x32xf32>
    %c1 = arith.constant 1 : index
    %c0_49 = arith.constant 0 : index
    %c0_50 = arith.constant 0 : index
    %151 = vector.load %arg5[%c1, %c0_49, %c0_50] : memref<2x4x96xf32, #tpu.memory_space<vmem>>, vector<1x4x96xf32>
    %152 = vector.shape_cast %151 : vector<1x4x96xf32> to vector<4x96xf32>
    %153 = vector.extract_strided_slice %152 {offsets = [0, 0], sizes = [1, 96], strides = [1, 1]} : vector<4x96xf32> to vector<1x96xf32>
    %154 = vector.extract_strided_slice %152 {offsets = [1, 0], sizes = [1, 32], strides = [1, 1]} : vector<4x96xf32> to vector<1x32xf32>
    %155 = vector.extract_strided_slice %152 {offsets = [1, 32], sizes = [1, 32], strides = [1, 1]} : vector<4x96xf32> to vector<1x32xf32>
    %156 = vector.extract_strided_slice %152 {offsets = [1, 64], sizes = [1, 32], strides = [1, 1]} : vector<4x96xf32> to vector<1x32xf32>
    %157 = vector.extract_strided_slice %152 {offsets = [2, 0], sizes = [1, 32], strides = [1, 1]} : vector<4x96xf32> to vector<1x32xf32>
    %158 = vector.extract_strided_slice %152 {offsets = [2, 32], sizes = [1, 32], strides = [1, 1]} : vector<4x96xf32> to vector<1x32xf32>
    %159 = vector.extract_strided_slice %152 {offsets = [2, 64], sizes = [1, 32], strides = [1, 1]} : vector<4x96xf32> to vector<1x32xf32>
    %160 = vector.extract_strided_slice %152 {offsets = [3, 0], sizes = [1, 64], strides = [1, 1]} : vector<4x96xf32> to vector<1x64xf32>
    %c1_51 = arith.constant 1 : index
    %c0_52 = arith.constant 0 : index
    %c0_53 = arith.constant 0 : index
    %161 = vector.load %arg3[%c1_51, %c0_52, %c0_53] : memref<2x32x96xf32, #tpu.memory_space<vmem>>, vector<1x32x96xf32>
    %162 = vector.shape_cast %161 : vector<1x32x96xf32> to vector<32x96xf32>
    %cst_54 = arith.constant dense<0.000000e+00> : vector<16x96xf32>
    %163 = tpu.matmul %150, %162, %cst_54 {dimension_numbers = #tpu.dot_dimension_numbers<[1], [0], [0], [1], [0, 0, 1, 1], [], []>} : vector<16x32xf32>, vector<32x96xf32>, vector<16x96xf32> -> vector<16x96xf32>
    %164 = vector.broadcast %153 : vector<1x96xf32> to vector<16x96xf32>
    %165 = arith.addf %163, %164 : vector<16x96xf32>
    %166 = vector.extract_strided_slice %165 {offsets = [0, 0], sizes = [16, 16], strides = [1, 1]} : vector<16x96xf32> to vector<16x16xf32>
    %167 = vector.shape_cast %166 : vector<16x16xf32> to vector<2x8x16xf32>
    %168 = vector.extract_strided_slice %165 {offsets = [0, 16], sizes = [16, 16], strides = [1, 1]} : vector<16x96xf32> to vector<16x16xf32>
    %169 = vector.shape_cast %168 : vector<16x16xf32> to vector<2x8x16xf32>
    %170 = vector.extract_strided_slice %165 {offsets = [0, 32], sizes = [16, 16], strides = [1, 1]} : vector<16x96xf32> to vector<16x16xf32>
    %171 = vector.shape_cast %170 : vector<16x16xf32> to vector<2x8x16xf32>
    %172 = vector.extract_strided_slice %165 {offsets = [0, 48], sizes = [16, 16], strides = [1, 1]} : vector<16x96xf32> to vector<16x16xf32>
    %173 = vector.shape_cast %172 : vector<16x16xf32> to vector<2x8x16xf32>
    %174 = vector.extract_strided_slice %165 {offsets = [0, 64], sizes = [16, 16], strides = [1, 1]} : vector<16x96xf32> to vector<16x16xf32>
    %175 = vector.shape_cast %174 : vector<16x16xf32> to vector<2x8x16xf32>
    %176 = vector.extract_strided_slice %165 {offsets = [0, 80], sizes = [16, 16], strides = [1, 1]} : vector<16x96xf32> to vector<16x16xf32>
    %177 = vector.shape_cast %176 : vector<16x16xf32> to vector<2x8x16xf32>
    %178 = vector.shape_cast %167 : vector<2x8x16xf32> to vector<1x2x8x16xf32>
    %179 = vector.shape_cast %169 : vector<2x8x16xf32> to vector<1x2x8x16xf32>
    %180 = vector.shape_cast %171 : vector<2x8x16xf32> to vector<1x2x8x16xf32>
    %181 = vector.shape_cast %173 : vector<2x8x16xf32> to vector<1x2x8x16xf32>
    %182 = vector.shape_cast %175 : vector<2x8x16xf32> to vector<1x2x8x16xf32>
    %183 = vector.shape_cast %177 : vector<2x8x16xf32> to vector<1x2x8x16xf32>
    %184 = tpu.concatenate %178, %179, %180, %181, %182, %183 in 0 : vector<1x2x8x16xf32>, vector<1x2x8x16xf32>, vector<1x2x8x16xf32>, vector<1x2x8x16xf32>, vector<1x2x8x16xf32>, vector<1x2x8x16xf32> -> vector<6x2x8x16xf32>
    %185 = vector.shape_cast %184 : vector<6x2x8x16xf32> to vector<12x8x16xf32>
    %186 = vector.extract_strided_slice %185 {offsets = [0, 0, 0], sizes = [4, 8, 16], strides = [1, 1, 1]} : vector<12x8x16xf32> to vector<4x8x16xf32>
    %187 = vector.extract_strided_slice %185 {offsets = [4, 0, 0], sizes = [4, 8, 16], strides = [1, 1, 1]} : vector<12x8x16xf32> to vector<4x8x16xf32>
    %188 = vector.extract_strided_slice %185 {offsets = [8, 0, 0], sizes = [4, 8, 16], strides = [1, 1, 1]} : vector<12x8x16xf32> to vector<4x8x16xf32>
    "tpu.trace_start"() <{level = 10 : i32, message = "gqd,gkd->gqk"}> : () -> ()
    %cst_55 = arith.constant dense<0.000000e+00> : vector<4x8x8xf32>
    %189 = tpu.matmul %186, %187, %cst_55 {dimension_numbers = #tpu.dot_dimension_numbers<[2], [2], [1], [1], [0, 0, 0, 1, 1, 1], [0], [0]>} : vector<4x8x16xf32>, vector<4x8x16xf32>, vector<4x8x8xf32> -> vector<4x8x8xf32>
    "tpu.trace_stop"() : () -> ()
    %cst_56 = arith.constant 2.500000e-01 : f32
    %190 = vector.broadcast %cst_56 : f32 to vector<4x8x8xf32>
    %191 = arith.mulf %189, %190 : vector<4x8x8xf32>
    %cst_57 = arith.constant dense<0xFF800000> : vector<4x8xf32>
    %192 = vector.multi_reduction <maximumf>, %191, %cst_57 [2] : vector<4x8x8xf32> to vector<4x8xf32>
    %193 = vector.shape_cast %192 : vector<4x8xf32> to vector<4x8x1xf32>
    %194 = vector.broadcast %193 : vector<4x8x1xf32> to vector<4x8x8xf32>
    %195 = arith.subf %191, %194 : vector<4x8x8xf32>
    %196 = math.exp %195 : vector<4x8x8xf32>
    %cst_58 = arith.constant dense<0.000000e+00> : vector<4x8xf32>
    %197 = vector.multi_reduction <add>, %196, %cst_58 [2] : vector<4x8x8xf32> to vector<4x8xf32>
    %198 = vector.shape_cast %197 : vector<4x8xf32> to vector<4x8x1xf32>
    %199 = tpu.reciprocal %198 {approx = true} : vector<4x8x1xf32> -> vector<4x8x1xf32>
    %200 = vector.broadcast %199 : vector<4x8x1xf32> to vector<4x8x8xf32>
    %201 = arith.mulf %196, %200 : vector<4x8x8xf32>
    "tpu.trace_start"() <{level = 10 : i32, message = "gqk,gkd->gqd"}> : () -> ()
    %cst_59 = arith.constant dense<0.000000e+00> : vector<4x8x16xf32>
    %202 = tpu.matmul %201, %188, %cst_59 {dimension_numbers = #tpu.dot_dimension_numbers<[2], [1], [1], [2], [0, 0, 0, 1, 1, 2], [0], [0]>} : vector<4x8x8xf32>, vector<4x8x16xf32>, vector<4x8x16xf32> -> vector<4x8x16xf32>
    "tpu.trace_stop"() : () -> ()
    %203 = vector.shape_cast %202 : vector<4x8x16xf32> to vector<2x16x16xf32>
    %c1_60 = arith.constant 1 : index
    %c0_61 = arith.constant 0 : index
    %c0_62 = arith.constant 0 : index
    %204 = vector.load %arg4[%c1_60, %c0_61, %c0_62] : memref<2x32x32xf32, #tpu.memory_space<vmem>>, vector<1x32x32xf32>
    %205 = vector.shape_cast %204 : vector<1x32x32xf32> to vector<32x32xf32>
    %206 = vector.shape_cast %205 : vector<32x32xf32> to vector<2x16x32xf32>
    "tpu.trace_start"() <{level = 10 : i32, message = "hrd,hde->hre"}> : () -> ()
    %cst_63 = arith.constant dense<0.000000e+00> : vector<2x16x32xf32>
    %207 = tpu.matmul %203, %206, %cst_63 {dimension_numbers = #tpu.dot_dimension_numbers<[2], [1], [1], [2], [0, 0, 0, 1, 1, 2], [0], [0]>} : vector<2x16x16xf32>, vector<2x16x32xf32>, vector<2x16x32xf32> -> vector<2x16x32xf32>
    "tpu.trace_stop"() : () -> ()
    %cst_64 = arith.constant dense<0.000000e+00> : vector<16x32xf32>
    %208 = vector.multi_reduction <add>, %207, %cst_64 [0] : vector<2x16x32xf32> to vector<16x32xf32>
    %209 = vector.broadcast %154 : vector<1x32xf32> to vector<16x32xf32>
    %210 = arith.addf %208, %209 : vector<16x32xf32>
    %211 = arith.addf %150, %210 : vector<16x32xf32>
    %cst_65 = arith.constant dense<0.000000e+00> : vector<16xf32>
    %212 = vector.multi_reduction <add>, %211, %cst_65 [1] : vector<16x32xf32> to vector<16xf32>
    %213 = vector.shape_cast %212 : vector<16xf32> to vector<16x1xf32>
    %cst_66 = arith.constant 3.200000e+01 : f32
    %214 = vector.broadcast %cst_66 : f32 to vector<16x1xf32>
    %215 = arith.divf %213, %214 : vector<16x1xf32>
    %216 = vector.broadcast %215 : vector<16x1xf32> to vector<16x32xf32>
    %217 = arith.subf %211, %216 : vector<16x32xf32>
    %218 = arith.mulf %217, %217 : vector<16x32xf32>
    %cst_67 = arith.constant dense<0.000000e+00> : vector<16xf32>
    %219 = vector.multi_reduction <add>, %218, %cst_67 [1] : vector<16x32xf32> to vector<16xf32>
    %220 = vector.shape_cast %219 : vector<16xf32> to vector<16x1xf32>
    %cst_68 = arith.constant 3.200000e+01 : f32
    %221 = vector.broadcast %cst_68 : f32 to vector<16x1xf32>
    %222 = arith.divf %220, %221 : vector<16x1xf32>
    %223 = vector.broadcast %215 : vector<16x1xf32> to vector<16x32xf32>
    %224 = arith.subf %211, %223 : vector<16x32xf32>
    %cst_69 = arith.constant 9.99999974E-6 : f32
    %225 = vector.broadcast %cst_69 : f32 to vector<16x1xf32>
    %226 = arith.addf %222, %225 : vector<16x1xf32>
    %227 = math.rsqrt %226 : vector<16x1xf32>
    %228 = vector.broadcast %227 : vector<16x1xf32> to vector<16x32xf32>
    %229 = arith.mulf %224, %228 : vector<16x32xf32>
    %230 = vector.broadcast %155 : vector<1x32xf32> to vector<16x32xf32>
    %231 = arith.mulf %229, %230 : vector<16x32xf32>
    %232 = vector.broadcast %156 : vector<1x32xf32> to vector<16x32xf32>
    %233 = arith.addf %231, %232 : vector<16x32xf32>
    %c1_70 = arith.constant 1 : index
    %c0_71 = arith.constant 0 : index
    %c0_72 = arith.constant 0 : index
    %234 = vector.load %arg6[%c1_70, %c0_71, %c0_72] : memref<2x32x64xf32, #tpu.memory_space<vmem>>, vector<1x32x64xf32>
    %235 = vector.shape_cast %234 : vector<1x32x64xf32> to vector<32x64xf32>
    %cst_73 = arith.constant dense<0.000000e+00> : vector<16x64xf32>
    %236 = tpu.matmul %233, %235, %cst_73 {dimension_numbers = #tpu.dot_dimension_numbers<[1], [0], [0], [1], [0, 0, 1, 1], [], []>} : vector<16x32xf32>, vector<32x64xf32>, vector<16x64xf32> -> vector<16x64xf32>
    %237 = vector.broadcast %160 : vector<1x64xf32> to vector<16x64xf32>
    %238 = arith.addf %236, %237 : vector<16x64xf32>
    %cst_74 = arith.constant 0.000000e+00 : f32
    %239 = vector.broadcast %cst_74 : f32 to vector<16x64xf32>
    %240 = arith.maximumf %238, %239 : vector<16x64xf32>
    %c1_75 = arith.constant 1 : index
    %c0_76 = arith.constant 0 : index
    %c0_77 = arith.constant 0 : index
    %241 = vector.load %arg7[%c1_75, %c0_76, %c0_77] : memref<2x64x32xf32, #tpu.memory_space<vmem>>, vector<1x64x32xf32>
    %242 = vector.shape_cast %241 : vector<1x64x32xf32> to vector<64x32xf32>
    %cst_78 = arith.constant dense<0.000000e+00> : vector<16x32xf32>
    %243 = tpu.matmul %240, %242, %cst_78 {dimension_numbers = #tpu.dot_dimension_numbers<[1], [0], [0], [1], [0, 0, 1, 1], [], []>} : vector<16x64xf32>, vector<64x32xf32>, vector<16x32xf32> -> vector<16x32xf32>
    %244 = vector.broadcast %159 : vector<1x32xf32> to vector<16x32xf32>
    %245 = arith.addf %243, %244 : vector<16x32xf32>
    %246 = arith.addf %233, %245 : vector<16x32xf32>
    %cst_79 = arith.constant dense<0.000000e+00> : vector<16xf32>
    %247 = vector.multi_reduction <add>, %246, %cst_79 [1] : vector<16x32xf32> to vector<16xf32>
    %248 = vector.shape_cast %247 : vector<16xf32> to vector<16x1xf32>
    %cst_80 = arith.constant 3.200000e+01 : f32
    %249 = vector.broadcast %cst_80 : f32 to vector<16x1xf32>
    %250 = arith.divf %248, %249 : vector<16x1xf32>
    %251 = vector.broadcast %250 : vector<16x1xf32> to vector<16x32xf32>
    %252 = arith.subf %246, %251 : vector<16x32xf32>
    %253 = arith.mulf %252, %252 : vector<16x32xf32>
    %cst_81 = arith.constant dense<0.000000e+00> : vector<16xf32>
    %254 = vector.multi_reduction <add>, %253, %cst_81 [1] : vector<16x32xf32> to vector<16xf32>
    %255 = vector.shape_cast %254 : vector<16xf32> to vector<16x1xf32>
    %cst_82 = arith.constant 3.200000e+01 : f32
    %256 = vector.broadcast %cst_82 : f32 to vector<16x1xf32>
    %257 = arith.divf %255, %256 : vector<16x1xf32>
    %258 = vector.broadcast %250 : vector<16x1xf32> to vector<16x32xf32>
    %259 = arith.subf %246, %258 : vector<16x32xf32>
    %cst_83 = arith.constant 9.99999974E-6 : f32
    %260 = vector.broadcast %cst_83 : f32 to vector<16x1xf32>
    %261 = arith.addf %257, %260 : vector<16x1xf32>
    %262 = math.rsqrt %261 : vector<16x1xf32>
    %263 = vector.broadcast %262 : vector<16x1xf32> to vector<16x32xf32>
    %264 = arith.mulf %259, %263 : vector<16x32xf32>
    %265 = vector.broadcast %157 : vector<1x32xf32> to vector<16x32xf32>
    %266 = arith.mulf %264, %265 : vector<16x32xf32>
    %267 = vector.broadcast %158 : vector<1x32xf32> to vector<16x32xf32>
    %268 = arith.addf %266, %267 : vector<16x32xf32>
    %269 = vector.extract_strided_slice %27 {offsets = [1, 0], sizes = [1, 64], strides = [1, 1]} : vector<4x64xf32> to vector<1x64xf32>
    %270 = vector.extract_strided_slice %27 {offsets = [2, 0], sizes = [1, 64], strides = [1, 1]} : vector<4x64xf32> to vector<1x64xf32>
    %271 = vector.extract_strided_slice %27 {offsets = [3, 0], sizes = [1, 32], strides = [1, 1]} : vector<4x64xf32> to vector<1x32xf32>
    %272 = vector.extract_strided_slice %27 {offsets = [3, 32], sizes = [1, 1], strides = [1, 1]} : vector<4x64xf32> to vector<1x1xf32>
    %273 = vector.extract_strided_slice %27 {offsets = [3, 33], sizes = [1, 1], strides = [1, 1]} : vector<4x64xf32> to vector<1x1xf32>
    %c0_84 = arith.constant 0 : index
    %c0_85 = arith.constant 0 : index
    %274 = vector.load %arg8[%c0_84, %c0_85] : memref<32x64xf32, #tpu.memory_space<vmem>>, vector<32x64xf32>
    %cst_86 = arith.constant dense<0.000000e+00> : vector<16x64xf32>
    %275 = tpu.matmul %268, %274, %cst_86 {dimension_numbers = #tpu.dot_dimension_numbers<[1], [0], [0], [1], [0, 0, 1, 1], [], []>} : vector<16x32xf32>, vector<32x64xf32>, vector<16x64xf32> -> vector<16x64xf32>
    %276 = vector.broadcast %269 : vector<1x64xf32> to vector<16x64xf32>
    %277 = arith.addf %275, %276 : vector<16x64xf32>
    %cst_87 = arith.constant 0.000000e+00 : f32
    %278 = vector.broadcast %cst_87 : f32 to vector<16x64xf32>
    %279 = arith.maximumf %277, %278 : vector<16x64xf32>
    %280 = vector.broadcast %270 : vector<1x64xf32> to vector<16x64xf32>
    %281 = arith.mulf %279, %280 : vector<16x64xf32>
    %cst_88 = arith.constant dense<0.000000e+00> : vector<16xf32>
    %282 = vector.multi_reduction <add>, %281, %cst_88 [1] : vector<16x64xf32> to vector<16xf32>
    %283 = vector.shape_cast %282 : vector<16xf32> to vector<16x1xf32>
    %284 = vector.broadcast %272 : vector<1x1xf32> to vector<16x1xf32>
    %285 = arith.addf %283, %284 : vector<16x1xf32>
    %286 = vector.shape_cast %285 : vector<16x1xf32> to vector<2x8x1xf32>
    %cst_89 = arith.constant dense<0xFF800000> : vector<2x1xf32>
    %287 = vector.multi_reduction <maximumf>, %286, %cst_89 [1] : vector<2x8x1xf32> to vector<2x1xf32>
    %288 = vector.shape_cast %287 : vector<2x1xf32> to vector<2x1x1xf32>
    %289 = vector.broadcast %288 : vector<2x1x1xf32> to vector<2x8x1xf32>
    %290 = arith.subf %286, %289 : vector<2x8x1xf32>
    %291 = math.exp %290 : vector<2x8x1xf32>
    %cst_90 = arith.constant dense<0.000000e+00> : vector<2x1xf32>
    %292 = vector.multi_reduction <add>, %291, %cst_90 [1] : vector<2x8x1xf32> to vector<2x1xf32>
    %293 = vector.shape_cast %292 : vector<2x1xf32> to vector<2x1x1xf32>
    %294 = tpu.reciprocal %293 {approx = true} : vector<2x1x1xf32> -> vector<2x1x1xf32>
    %295 = vector.broadcast %294 : vector<2x1x1xf32> to vector<2x8x1xf32>
    %296 = arith.mulf %291, %295 : vector<2x8x1xf32>
    %297 = vector.shape_cast %268 : vector<16x32xf32> to vector<2x8x32xf32>
    %298 = vector.broadcast %296 : vector<2x8x1xf32> to vector<2x8x32xf32>
    %299 = arith.mulf %298, %297 : vector<2x8x32xf32>
    %cst_91 = arith.constant dense<0.000000e+00> : vector<2x32xf32>
    %300 = vector.multi_reduction <add>, %299, %cst_91 [1] : vector<2x8x32xf32> to vector<2x32xf32>
    %301 = vector.broadcast %271 : vector<1x32xf32> to vector<2x32xf32>
    %302 = arith.mulf %300, %301 : vector<2x32xf32>
    %cst_92 = arith.constant dense<0.000000e+00> : vector<2xf32>
    %303 = vector.multi_reduction <add>, %302, %cst_92 [1] : vector<2x32xf32> to vector<2xf32>
    %304 = vector.shape_cast %303 : vector<2xf32> to vector<2x1xf32>
    %305 = vector.broadcast %273 : vector<1x1xf32> to vector<2x1xf32>
    %306 = arith.addf %304, %305 : vector<2x1xf32>
    %cst_93 = arith.constant 0.000000e+00 : f32
    %307 = vector.broadcast %cst_93 : f32 to vector<2x1xf32>
    %308 = arith.subf %307, %306 : vector<2x1xf32>
    %309 = math.exp %308 : vector<2x1xf32>
    %cst_94 = arith.constant 1.000000e+00 : f32
    %310 = vector.broadcast %cst_94 : f32 to vector<2x1xf32>
    %311 = arith.addf %310, %309 : vector<2x1xf32>
    %312 = tpu.reciprocal %311 {approx = true} : vector<2x1xf32> -> vector<2x1xf32>
    %c0_95 = arith.constant 0 : index
    %c0_96 = arith.constant 0 : index
    %313 = vector.load %arg10[%c0_95, %c0_96] : memref<2x1xf32, #tpu.memory_space<vmem>>, vector<2x1xf32>
    tpu.vector_store %arg10[%c0_95, %c0_96], %312 {strides = array<i32>} : memref<2x1xf32, #tpu.memory_space<vmem>>, vector<2x1xf32>,
    return
  }
}

</mosaic_0001>

<bundles_post_ra>
// kernel: tpu_custom_call.1
= control target key start
LH: loop header
LB: loop body
LE: loop exit
PB: predicated region body
PF: predicated region fallthrough
CT: control target
= control target key end

     0   :  { %vm37_vm0 = vcmask 523264   ;;  %v68_v41 = vlaneseq  ;;  %vm183_vm1 = vcmask 261120   ;;  %vm3345_vm2 = vmmov 0   ;;  %s3346_s24 = smov 80   ;;  %s3347_s25 = smov 96   ;;  %s3867_s2 = inlined_call_operand.vmem [shape: f32[64,32], index: 2, kind: input, shape index: {}]   ;;  %s3868_s0 = inlined_call_operand.vmem [shape: f32[2,8,64], index: 0, kind: input, shape index: {}]   ;;  %s3869_s3 = inlined_call_operand.vmem [shape: f32[2,32,96], index: 3, kind: input, shape index: {}]   ;;  %s3870_s1 = inlined_call_operand.vmem [shape: f32[2,64], index: 1, kind: input, shape index: {}]   ;;  %s3871_s9 = inlined_call_operand.vmem [shape: f32[4,64], index: 9, kind: input, shape index: {}]   ;;  %s3872_s5 = inlined_call_operand.vmem [shape: f32[2,4,96], index: 5, kind: input, shape index: {}]   ;;  %s3873_s4 = inlined_call_operand.vmem [shape: f32[2,32,32], index: 4, kind: input, shape index: {}]   ;;  %s3874_s6 = inlined_call_operand.vmem [shape: f32[2,32,64], index: 6, kind: input, shape index: {}]   ;;  %s3875_s7 = inlined_call_operand.vmem [shape: f32[2,64,32], index: 7, kind: input, shape index: {}]   ;;  %s3876_s8 = inlined_call_operand.vmem [shape: f32[32,64], index: 8, kind: input, shape index: {}]   ;;  %s3877_s10 = inlined_call_operand.vmem [shape: f32[2,1], index: 10, kind: output, shape index: {}]  }
   0x1   :  { %v81_v0 = vld [vmem:[%s3867_s2] sm:$0xff]  ;;  %v82_v1 = vld [vmem:[%s3867_s2 + $0x8] sm:$0xff]  ;;  %v83_v2 = vld [vmem:[%s3867_s2 + $0x10] sm:$0xff]  ;;  %s3348_s26 = smov 112   ;;  %vm291_vm3 = vcmask 130048   ;;  %vm592_vm4 = vcmask 64512  }
   0x2   :  { %v3166_v3 = vpack.c.bf16 %v82_v1, %v81_v0  ;;  %v84_v4 = vld [vmem:[%s3867_s2 + $0x18] sm:$0xff]  ;;  %v85_v6 = vld [vmem:[%s3867_s2 + $0x20] sm:$0xff]  ;;  %v86_v7 = vld [vmem:[%s3867_s2 + $0x28] sm:$0xff]  ;;  %v3448_v43 = vshrl.u32 %v68_v41, 7  ;;  %v3344_v1 = vmov 0.0   ;;  %s3349_s27 = smov 64  }
   0x3   :  { %v3170_v5 = vpack.c.bf16 %v84_v4, %v83_v2  ;;  %v35_v8 = vld [vmem:[%s3868_s0] sm:$0xff]  ;;  %v36_v9 = vld [vmem:[%s3868_s0 + $0x8] sm:$0xff]  ;;  %v3174_v14 = vpack.c.bf16 %v86_v7, %v85_v6  ;;  %v87_v17 = vld [vmem:[%s3867_s2 + $0x30] sm:$0xff]  ;;  %s3350_s28 = smov 48   ;;  %vm2676_vm5 = vcmask 269568   ;;  %vm2746_vm6 = vcmask 1041409  }
   0x4   :  { %3167 = vmatprep.subr.bf16.mxu0 %v3166_v3  ;;  %v38_v10 = vsel %vm37_vm0, %v35_v8, 0.0  ;;  %v39_v11 = vsel %vm37_vm0, %v36_v9, 0.0  ;;  %v175_v12 = vld [vmem:[%s3869_s3] sm:$0xff]  ;;  %v176_v13 = vld [vmem:[%s3869_s3 + $0x8] sm:$0xff]  ;;  %v88_v18 = vld [vmem:[%s3867_s2 + $0x38] sm:$0xff]  ;;  %v3451_v44 = vsub.s32 0, %v3448_v43 }
   0x5   :  { %3169 = vmatpush3.bf16.msra.mxu0 %v3166_v3  ;;  %v40_v15 = vadd.f32 %v39_v11, %v38_v10  ;;  %v3182_v16 = vpack.c.bf16 %v176_v13, %v175_v12  ;;  %v3178_v20 = vpack.c.bf16 %v88_v18, %v87_v17  ;;  %v63_v45 = vld [vmem:[%s3870_s1] sm:$0x3]  ;;  %v3457_v46 = vsub.s32 1, %v3448_v43  ;;  %v177_v56 = vld [vmem:[%s3869_s3 + $0x10] sm:$0xff]  ;;  %v178_v57 = vld [vmem:[%s3869_s3 + $0x18] sm:$0xff] }
   0x6   :  { %3171 = vmatprep.subr.bf16.mxu0 %v3170_v5  ;;  %v71_v47 = vrot.slane %v63_v45, %v3451_v44  ;;  %v3186_v58 = vpack.c.bf16 %v178_v57, %v177_v56  ;;  %v80_v59 = vld [vmem:[%s3871_s9] sm:$0xf]  ;;  %vm2749_vm7 = vcmask 254976   ;;  %vm2763_vm8 = vcmask 1024  }
   0x7   :  { %v41_v19 = vrot.slane %v40_v15, 4  ;;  %3183 = vmatprep.subr.bf16.mxu1 %v3182_v16  ;;  %v77_v51 = vrot.slane %v63_v45, %v3457_v46  ;;  %v92_v60 = vrot.slane %v80_v59, %v3451_v44  ;;  %v3490_v2 = vld [vmem:[%s3872_s5] sm:$0xf] }
   0x8   :  { %3185 = vmatpush3.bf16.msra.mxu1 %v3182_v16  ;;  %v182_v3 = vrot.slane %v3490_v2, %v3451_v44 }
   0x9   :  { %3173 = vmatpush3.bf16.msra.mxu0 %v3170_v5  ;;  %v42_v21 = vadd.f32 %v41_v19, %v40_v15  ;;  %3187 = vmatprep.subr.bf16.mxu1 %v3186_v58 }
   0xa   :  { %3175 = vmatprep.subr.bf16.mxu0 %v3174_v14 }
   0xb   :  { %v43_v22 = vrot.slane %v42_v21, 2 }
   0xc   :  { %3189 = vmatpush3.bf16.msra.mxu1 %v3186_v58 }
   0xd   :  { %3177 = vmatpush3.bf16.msra.mxu0 %v3174_v14  ;;  %v44_v23 = vadd.f32 %v43_v22, %v42_v21  ;;  %2976 = vmatprep.subr.mxu1 %v3344_v1 }
   0xe   :  { %3179 = vmatprep.subr.bf16.mxu0 %v3178_v20 }
   0xf   :  { %v45_v24 = vrot.slane %v44_v23, 1 }
  0x11   :  { %3181 = vmatpush3.bf16.msra.mxu0 %v3178_v20  ;;  %v46_v25 = vadd.f32 %v45_v24, %v44_v23 }
  0x12   :  { %2986 = vmatprep.subr.mxu0 %v3344_v1 }
  0x13   :  { %v48_v26 = vmul.f32 0.0625, %v46_v25 }
  0x15   :  { %v49_v27 = vsub.f32 %v35_v8, %v48_v26  ;;  %v50_v28 = vsub.f32 %v36_v9, %v48_v26 }
  0x17   :  { %v51_v29 = vmul.f32 %v49_v27, %v49_v27  ;;  %v52_v30 = vmul.f32 %v50_v28, %v50_v28 }
  0x19   :  { %v53_v31 = vsel %vm37_vm0, %v51_v29, 0.0  ;;  %v54_v32 = vsel %vm37_vm0, %v52_v30, 0.0 }
  0x1a   :  { %v55_v33 = vadd.f32 %v54_v32, %v53_v31 }
  0x1c   :  { %v56_v34 = vrot.slane %v55_v33, 4 }
  0x1e   :  { %v57_v35 = vadd.f32 %v56_v34, %v55_v33 }
  0x20   :  { %v58_v36 = vrot.slane %v57_v35, 2 }
  0x22   :  { %v59_v37 = vadd.f32 %v58_v36, %v57_v35 }
  0x24   :  { %v60_v38 = vrot.slane %v59_v37, 1 }
  0x26   :  { %v61_v39 = vadd.f32 %v60_v38, %v59_v37 }
  0x28   :  { %v62_v40 = vmul.f32 0.0625, %v61_v39 }
  0x2a   :  { %v64_v42 = vadd.f32 1e-05, %v62_v40 }
  0x2c   :  { %3281 = vrsqrt.f32 %v64_v42 }
  0x36   :  { %v3282_v48 = vpop.eup %3281 }
  0x37   :  { %v66_v49 = vmul.f32 %v3282_v48, %v49_v27  ;;  %v67_v50 = vmul.f32 %v3282_v48, %v50_v28 }
  0x39   :  { %v72_v52 = vmul.f32 %v71_v47, %v66_v49  ;;  %v73_v53 = vmul.f32 %v71_v47, %v67_v50 }
  0x3b   :  { %v78_v54 = vadd.f32 %v77_v51, %v72_v52  ;;  %v79_v55 = vadd.f32 %v77_v51, %v73_v53 }
  0x3d   :  { %2962 = vmatprep.mubr.msk.f32.mxu0 %vm37_vm0, %v78_v54 }
  0x3e   :  { %2963 = vmatmul.mubr.msk.f32.vlgmr.msra.gmra.mrb[0].mxu0 %vm37_vm0, %v79_v55 }
  0x3f   :  { %2988 = vmatprep.mubr.msk.f32.mxu0 %vm3345_vm2, %v3344_v1 }
 0x111   :  { %v2964_v61 = vpop.f32.mrb[0].mxu0 }
 0x112   :  { %v165_v62 = vpop.f32.mrb[1].mxu0  ;;  %v3475_v0 = vadd.f32 %v2964_v61, %v92_v60 }
 0x113   :  { %v3473_v63 = vadd.f32 %v165_v62, %v92_v60 }
 0x115   :  { %2973 = vmatprep.mubr.msk.f32.mxu1 %vm183_vm1, %v3473_v63 }
 0x116   :  { %2974 = vmatmul.mubr.msk.f32.vlgmr.msra.gmra.mrb[0].mxu1 %vm183_vm1, %v3475_v0 }
 0x117   :  { %2978 = vmatprep.mubr.msk.f32.mxu1 %vm3345_vm2, %v3344_v1 }
 0x1e9   :  { %v2975_v4 = vpop.f32.mrb[0].mxu1 }
 0x1ea   :  { %v3494_v5 = vadd.f32 %v2975_v4, %v182_v3  ;;  %v256_v6 = vpop.f32.mrb[1].mxu1 }
 0x1eb   :  { %v3496_v7 = vadd.f32 %v256_v6, %v182_v3 }
 0x1ec   :  { %277 = vrot.lane.b32.xlu1 %v3494_v5, %s3346_s24 }
 0x1ed   :  { %271 = vrot.lane.b32.xlu0 %v3496_v7, %s3347_s25 }
 0x1f0   :  { %275 = vrot.lane.b32.xlu1 %v3496_v7, %s3346_s24 }
 0x1f1   :  { %273 = vrot.lane.b32.xlu0 %v3494_v5, %s3347_s25 }
 0x1f4   :  { %269 = vrot.lane.b32.xlu1 %v3494_v5, %s3348_s26 }
 0x1f5   :  { %267 = vrot.lane.b32.xlu0 %v3496_v7, %s3348_s26 }
 0x25e   :  { %v278_v8 = vpop.permute.xlu1 %277 }
 0x25f   :  { %v272_v9 = vpop.permute.xlu0 %271 }
 0x260   :  { %2977 = vmatpush3.xpose.msk.msra.mxu1 %vm291_vm3, %v272_v9  ;;  %v929_v9 = vld [vmem:[%s3873_s4] sm:$0xff] }
 0x261   :  { %2981 = vmatprep.subr.mxu1 %v3344_v1 }
 0x262   :  { %v276_v10 = vpop.permute.xlu1 %275 }
 0x263   :  { %2979 = vmatmul.mubr.msk.f32.vlgmr.msra.gmra.mrb[2].mxu1 %vm291_vm3, %v3496_v7  ;;  %2987 = vmatpush3.xpose.msk.msra.mxu0 %vm291_vm3, %v276_v10  ;;  %v274_v11 = vpop.permute.xlu0 %273  ;;  %v930_v10 = vld [vmem:[%s3873_s4 + $0x8] sm:$0xff] }
 0x264   :  { %2982 = vmatpush3.xpose.msk.msra.mxu1 %vm291_vm3, %v274_v11  ;;  %2983 = vmatprep.mubr.msk.f32.mxu1 %vm3345_vm2, %v3344_v1  ;;  %v3190_v11 = vpack.c.bf16 %v930_v10, %v929_v9 }
 0x265   :  { %2991 = vmatprep.subr.mxu1 %v3344_v1  ;;  %2996 = vmatprep.subr.mxu0 %v3344_v1 }
 0x266   :  { %v270_v13 = vpop.permute.xlu1 %269 }
 0x267   :  { %2984 = vmatmul.mubr.msk.f32.vlgmr.msra.gmra.mrb[4].mxu1 %vm291_vm3, %v3494_v5  ;;  %v268_v12 = vpop.permute.xlu0 %267 }
 0x268   :  { %2989 = vmatmul.mubr.msk.f32.vlgmr.msra.gmra.mrb[2].mxu0 %vm291_vm3, %v268_v12  ;;  %2992 = vmatpush3.xpose.msk.msra.mxu1 %vm291_vm3, %v278_v8  ;;  %v931_v12 = vld [vmem:[%s3873_s4 + $0x10] sm:$0xff] }
 0x269   :  { %2993 = vmatprep.mubr.msk.f32.mxu1 %vm3345_vm2, %v3344_v1  ;;  %2998 = vmatprep.mubr.msk.f32.mxu0 %vm3345_vm2, %v3344_v1 }
 0x26a   :  { %3001 = vmatprep.subr.mxu1 %v3344_v1 }
 0x26b   :  { %2994 = vmatmul.mubr.msk.f32.vlgmr.msra.gmra.mrb[6].mxu1 %vm291_vm3, %v270_v13  ;;  %v932_v13 = vld [vmem:[%s3873_s4 + $0x18] sm:$0xff] }
 0x26c   :  { %3003 = vmatprep.mubr.msk.f32.mxu1 %vm3345_vm2, %v3344_v1 }
 0x336   :  { %v362_v14 = vpop.f32.mrb[2].mxu1 }
 0x337   :  { %v588_v15 = vmul.f32 0.25, %v362_v14  ;;  %v2980_v16 = vpop.f32.mrb[3].mxu1  ;;  %v3194_v14 = vpack.c.bf16 %v932_v13, %v931_v12 }
 0x339   :  { %v593_v17 = vsel %vm592_vm4, %v588_v15, -inf }
 0x33a   :  { %594 = vmax.xlane.f32.xlu0 %v593_v17  ;;  %v436_v18 = vpop.f32.mrb[4].mxu1 }
 0x33b   :  { %v589_v19 = vmul.f32 0.25, %v436_v18  ;;  %v2985_v20 = vpop.f32.mrb[5].mxu1  ;;  %v510_v21 = vpop.f32.mrb[2].mxu0 }
 0x33c   :  { %v590_v22 = vmul.f32 0.25, %v510_v21  ;;  %v2990_v23 = vpop.f32.mrb[3].mxu0 }
 0x33d   :  { %v596_v24 = vsel %vm592_vm4, %v589_v19, -inf }
 0x33e   :  { %597 = vmax.xlane.f32.xlu1 %v596_v24  ;;  %v584_v25 = vpop.f32.mrb[6].mxu1  ;;  %v599_v26 = vsel %vm592_vm4, %v590_v22, -inf }
 0x33f   :  { %v591_v27 = vmul.f32 0.25, %v584_v25  ;;  %v2995_v28 = vpop.f32.mrb[7].mxu1  ;;  %600 = vmax.xlane.f32.xlu0 %v599_v26  ;;  %v1104_v25 = vrot.slane %v3490_v2, %v3457_v46 }
 0x341   :  { %v602_v29 = vsel %vm592_vm4, %v591_v27, -inf }
 0x343   :  { %603 = vmax.xlane.f32.xlu0 %v602_v29 }
 0x34f   :  { %279 = vrot.lane.b32.xlu1 %v3496_v7, %s3349_s27 }
 0x3c7   :  { %v595_v30 = vpop.xlane.xlu0 %594 }
 0x3c8   :  { %v605_v31 = vsub.f32 %v588_v15, %v595_v30 }
 0x3ca   :  { %v609_v32 = vmul.f32 1.442695, %v605_v31 }
 0x3cb   :  { %v598_v33 = vpop.xlane.xlu1 %597 }
 0x3cc   :  { %3283 = vpow2.f32 %v609_v32  ;;  %v606_v34 = vsub.f32 %v589_v19, %v598_v33  ;;  %v601_v35 = vpop.xlane.xlu0 %600 }
 0x3cd   :  { %v607_v36 = vsub.f32 %v590_v22, %v601_v35 }
 0x3ce   :  { %v611_v37 = vmul.f32 1.442695, %v606_v34 }
 0x3cf   :  { %v613_v38 = vmul.f32 1.442695, %v607_v36  ;;  %v280_v39 = vpop.permute.xlu1 %279 }
 0x3d0   :  { %3285 = vpow2.f32 %v611_v37  ;;  %2997 = vmatpush3.msra.mxu0 %v280_v39  ;;  %v604_v40 = vpop.xlane.xlu0 %603 }
 0x3d1   :  { %3287 = vpow2.f32 %v613_v38  ;;  %v608_v41 = vsub.f32 %v591_v27, %v604_v40  ;;  %3006 = vmatprep.subr.mxu0 %v3344_v1 }
 0x3d3   :  { %v615_v42 = vmul.f32 1.442695, %v608_v41 }
 0x3d5   :  { %3289 = vpow2.f32 %v615_v42 }
 0x3d6   :  { %v3284_v45 = vpop.eup %3283 }
 0x3d7   :  { %v617_v47 = vsel %vm592_vm4, %v3284_v45, 0.0 }
 0x3d8   :  { %618 = vadd.xlane.f32.xlu1 %v617_v47 }
 0x3da   :  { %v3286_v48 = vpop.eup %3285 }
 0x3db   :  { %v3288_v49 = vpop.eup %3287  ;;  %v620_v50 = vsel %vm592_vm4, %v3286_v48, 0.0 }
 0x3dc   :  { %621 = vadd.xlane.f32.xlu0 %v620_v50  ;;  %v623_v51 = vsel %vm592_vm4, %v3288_v49, 0.0 }
 0x3dd   :  { %624 = vadd.xlane.f32.xlu1 %v623_v51  ;;  %v1147_v51 = vld [vmem:[%s3874_s6] sm:$0xff] }
 0x3df   :  { %v3290_v52 = vpop.eup %3289 }
 0x3e0   :  { %v626_v53 = vsel %vm592_vm4, %v3290_v52, 0.0 }
 0x3e1   :  { %627 = vadd.xlane.f32.xlu0 %v626_v53 }
 0x3ee   :  { %285 = vrot.lane.b32.xlu1 %v3496_v7, %s3350_s28 }
 0x3f2   :  { %287 = vrot.lane.b32.xlu1 %v3494_v5, %s3350_s28 }
 0x3f7   :  { %281 = vrot.lane.b32.xlu0 %v3494_v5, %s3349_s27 }
 0x465   :  { %v619_v54 = vpop.xlane.xlu1 %618 }
 0x466   :  { %3291 = vrcp.f32 %v619_v54  ;;  %v1149_v54 = vld [vmem:[%s3874_s6 + $0x10] sm:$0xff] }
 0x469   :  { %v622_v55 = vpop.xlane.xlu0 %621 }
 0x46a   :  { %3293 = vrcp.f32 %v622_v55  ;;  %v625_v56 = vpop.xlane.xlu1 %624  ;;  %v1150_v55 = vld [vmem:[%s3874_s6 + $0x18] sm:$0xff] }
 0x46b   :  { %3295 = vrcp.f32 %v625_v56  ;;  %v3202_v56 = vpack.c.bf16 %v1150_v55, %v1149_v54  ;;  %v2795_v54 = vld [vmem:[%s3869_s3 + $0x28] sm:$0xff] }
 0x46e   :  { %v628_v57 = vpop.xlane.xlu0 %627  ;;  %v286_v60 = vpop.permute.xlu1 %285 }
 0x46f   :  { %3297 = vrcp.f32 %v628_v57  ;;  %v1238_v57 = vld [vmem:[%s3875_s7] sm:$0xff] }
 0x470   :  { %v3292_v58 = vpop.eup %3291 }
 0x471   :  { %v633_v59 = vmul.f32 %v3292_v58, %v3284_v45  ;;  %v1239_v58 = vld [vmem:[%s3875_s7 + $0x8] sm:$0xff] }
 0x472   :  { %v282_v61 = vpop.permute.xlu0 %281  ;;  %v288_v6 = vpop.permute.xlu1 %287 }
 0x473   :  { %2999 = vmatmul.mubr.msk.f32.vlgmr.msra.gmra.mrb[4].mxu0 %vm592_vm4, %v633_v59  ;;  %3002 = vmatpush3.msra.mxu1 %v282_v61  ;;  %v1240_v59 = vld [vmem:[%s3875_s7 + $0x10] sm:$0xff]  ;;  %v1241_v61 = vld [vmem:[%s3875_s7 + $0x18] sm:$0xff] }
 0x474   :  { %v3294_v62 = vpop.eup %3293  ;;  %3007 = vmatpush3.msra.mxu0 %v286_v60  ;;  %3011 = vmatprep.subr.mxu1 %v3344_v1  ;;  %v3206_v60 = vpack.c.bf16 %v1239_v58, %v1238_v57  ;;  %v2797_v57 = vld [vmem:[%s3869_s3 + $0x38] sm:$0xff] }
 0x475   :  { %v3296_v3 = vpop.eup %3295  ;;  %v634_v4 = vmul.f32 %v3294_v62, %v3286_v48  ;;  %3008 = vmatprep.mubr.msk.f32.mxu0 %vm3345_vm2, %v3344_v1  ;;  %3191 = vmatprep.subr.bf16.mxu0 %v3190_v11  ;;  %v3210_v62 = vpack.c.bf16 %v1241_v61, %v1240_v59 }
 0x476   :  { %v635_v5 = vmul.f32 %v3296_v3, %v3288_v49  ;;  %v1242_v3 = vld [vmem:[%s3875_s7 + $0x20] sm:$0xff] }
 0x477   :  { %3004 = vmatmul.mubr.msk.f32.vlgmr.msra.gmra.mrb[8].mxu1 %vm592_vm4, %v634_v4  ;;  %v1243_v4 = vld [vmem:[%s3875_s7 + $0x28] sm:$0xff] }
 0x478   :  { %3012 = vmatpush3.msra.mxu1 %v288_v6  ;;  %3009 = vmatmul.mubr.msk.f32.vlgmr.msra.gmra.mrb[6].mxu0 %vm592_vm4, %v635_v5  ;;  %v3214_v5 = vpack.c.bf16 %v1243_v4, %v1242_v3 }
 0x479   :  { %v3298_v7 = vpop.eup %3297  ;;  %3013 = vmatprep.mubr.msk.f32.mxu1 %vm3345_vm2, %v3344_v1  ;;  %3193 = vmatpush3.bf16.msra.mxu0 %v3190_v11 }
 0x47a   :  { %v636_v8 = vmul.f32 %v3298_v7, %v3290_v52  ;;  %3195 = vmatprep.subr.bf16.mxu1 %v3194_v14  ;;  %v1148_v52 = vld [vmem:[%s3874_s6 + $0x8] sm:$0xff] }
 0x47b   :  { %v3198_v53 = vpack.c.bf16 %v1148_v52, %v1147_v51 }
 0x47c   :  { %3014 = vmatmul.mubr.msk.f32.vlgmr.msra.gmra.mrb[10].mxu1 %vm592_vm4, %v636_v8 }
 0x47d   :  { %3197 = vmatpush3.bf16.msra.mxu1 %v3194_v14  ;;  %3199 = vmatprep.subr.bf16.mxu0 %v3198_v53 }
 0x47e   :  { %3207 = vmatprep.subr.bf16.mxu1 %v3206_v60 }
 0x546   :  { %v706_v15 = vpop.f32.mrb[4].mxu0 }
 0x547   :  { %v3000_v16 = vpop.f32.mrb[5].mxu0  ;;  %3020 = vmatprep.mubr.msk.f32.mxu0 %vm291_vm3, %v706_v15 }
 0x54a   :  { %v779_v17 = vpop.f32.mrb[8].mxu1 }
 0x54b   :  { %v3005_v18 = vpop.f32.mrb[9].mxu1  ;;  %v852_v19 = vpop.f32.mrb[6].mxu0  ;;  %3021 = vmatmul.mubr.msk.f32.vlgmr.msra.gmra.mrb[8].mxu0 %vm291_vm3, %v779_v17 }
 0x54c   :  { %v3010_v20 = vpop.f32.mrb[7].mxu0  ;;  %3027 = vmatprep.mubr.msk.f32.mxu1 %vm291_vm3, %v852_v19  ;;  %3201 = vmatpush3.bf16.msra.mxu0 %v3198_v53  ;;  %v2794_v53 = vld [vmem:[%s3869_s3 + $0x20] sm:$0xff] }
 0x54d   :  { %3203 = vmatprep.subr.bf16.mxu0 %v3202_v56  ;;  %v3222_v55 = vpack.c.bf16 %v2795_v54, %v2794_v53 }
 0x54f   :  { %v925_v21 = vpop.f32.mrb[10].mxu1 }
 0x550   :  { %v3015_v22 = vpop.f32.mrb[11].mxu1  ;;  %3028 = vmatmul.mubr.msk.f32.vlgmr.msra.gmra.mrb[12].mxu1 %vm291_vm3, %v925_v21  ;;  %3205 = vmatpush3.bf16.msra.mxu0 %v3202_v56  ;;  %v2796_v56 = vld [vmem:[%s3869_s3 + $0x30] sm:$0xff] }
 0x551   :  { %3209 = vmatpush3.bf16.msra.mxu1 %v3206_v60  ;;  %v1244_v22 = vld [vmem:[%s3875_s7 + $0x30] sm:$0xff]  ;;  %3223 = vmatprep.subr.bf16.mxu0 %v3222_v55  ;;  %v3226_v58 = vpack.c.bf16 %v2797_v57, %v2796_v56 }
 0x552   :  { %3211 = vmatprep.subr.bf16.mxu1 %v3210_v62 }
 0x555   :  { %3213 = vmatpush3.bf16.msra.mxu1 %v3210_v62 }
 0x556   :  { %3215 = vmatprep.subr.bf16.mxu1 %v3214_v5 }
 0x559   :  { %3217 = vmatpush3.bf16.msra.mxu1 %v3214_v5 }
 0x61e   :  { %v3022_v23 = vpop.f32.mrb[8].mxu0 }
 0x61f   :  { %v1005_v24 = vpop.f32.mrb[9].mxu0  ;;  %v1098_v27 = vsel %vm183_vm1, %v3022_v23, 0.0  ;;  %v1245_v23 = vld [vmem:[%s3875_s7 + $0x38] sm:$0xff] }
 0x620   :  { %v1095_v30 = vsel %vm183_vm1, %v1005_v24, 0.0  ;;  %v3218_v24 = vpack.c.bf16 %v1245_v23, %v1244_v22 }
 0x622   :  { %3219 = vmatprep.subr.bf16.mxu1 %v3218_v24 }
 0x623   :  { %v3029_v26 = vpop.f32.mrb[12].mxu1  ;;  %3221 = vmatpush3.bf16.msra.mxu1 %v3218_v24 }
 0x624   :  { %v1099_v28 = vsel %vm183_vm1, %v3029_v26, 0.0  ;;  %v1086_v29 = vpop.f32.mrb[13].mxu1  ;;  %3076 = vmatprep.subr.mxu1 %v3344_v1 }
 0x625   :  { %v1100_v31 = vadd.f32 %v1099_v28, %v1098_v27  ;;  %v1096_v32 = vsel %vm183_vm1, %v1086_v29, 0.0  ;;  %v3634_v27 = vsub.s32 3, %v3448_v43 }
 0x626   :  { %v1097_v33 = vadd.f32 %v1096_v32, %v1095_v30 }
 0x627   :  { %v1106_v34 = vadd.f32 %v1104_v25, %v1100_v31  ;;  %v1154_v28 = vrot.slane %v3490_v2, %v3634_v27 }
 0x628   :  { %v1105_v35 = vadd.f32 %v1104_v25, %v1097_v33 }
 0x629   :  { %v1108_v36 = vadd.f32 %v1106_v34, %v3475_v0 }
 0x62a   :  { %v1107_v37 = vadd.f32 %v1105_v35, %v3473_v63 }
 0x62b   :  { %v1112_v38 = vsel %vm183_vm1, %v1108_v36, 0.0 }
 0x62c   :  { %1113 = vadd.xlane.f32.xlu1 %v1112_v38  ;;  %v1109_v39 = vsel %vm183_vm1, %v1107_v37, 0.0 }
 0x62d   :  { %1110 = vadd.xlane.f32.xlu0 %v1109_v39 }
 0x63d   :  { %1137 = vrot.lane.b32.xlu1 %v1104_v25, %s3347_s25 }
 0x6b9   :  { %v1114_v40 = vpop.xlane.xlu1 %1113 }
 0x6ba   :  { %v1117_v41 = vmul.f32 0.03125, %v1114_v40  ;;  %v1111_v42 = vpop.xlane.xlu0 %1110 }
 0x6bb   :  { %v1116_v45 = vmul.f32 0.03125, %v1111_v42 }
 0x6bc   :  { %v1119_v47 = vsub.f32 %v1108_v36, %v1117_v41 }
 0x6bd   :  { %v1118_v48 = vsub.f32 %v1107_v37, %v1116_v45  ;;  %v1138_v13 = vpop.permute.xlu1 %1137 }
 0x6be   :  { %v1121_v0 = vmul.f32 %v1119_v47, %v1119_v47 }
 0x6bf   :  { %v1120_v49 = vmul.f32 %v1118_v48, %v1118_v48 }
 0x6c0   :  { %v1125_v63 = vsel %vm183_vm1, %v1121_v0, 0.0 }
 0x6c1   :  { %v1122_v50 = vsel %vm183_vm1, %v1120_v49, 0.0 }
 0x6c2   :  { %1123 = vadd.xlane.f32.xlu0 %v1122_v50 }
 0x6c6   :  { %1126 = vadd.xlane.f32.xlu0 %v1125_v63 }
 0x6dc   :  { %1142 = vrot.lane.b32.xlu0 %v1104_v25, %s3349_s27  ;;  %v3628_v25 = vsub.s32 2, %v3448_v43 }
 0x6de   :  { %v1249_v26 = vrot.slane %v3490_v2, %v3628_v25 }
 0x6e0   :  { %1251 = vrot.lane.b32.xlu1 %v1249_v26, %s3349_s27 }
 0x74f   :  { %v1124_v6 = vpop.xlane.xlu0 %1123 }
 0x750   :  { %v1128_v7 = vmul.f32 0.03125, %v1124_v6 }
 0x752   :  { %v1130_v8 = vadd.f32 1e-05, %v1128_v7  ;;  %v1252_v35 = vpop.permute.xlu1 %1251 }
 0x753   :  { %v1127_v9 = vpop.xlane.xlu0 %1126 }
 0x754   :  { %3299 = vrsqrt.f32 %v1130_v8  ;;  %v1129_v10 = vmul.f32 0.03125, %v1127_v9 }
 0x756   :  { %v1131_v11 = vadd.f32 1e-05, %v1129_v10 }
 0x757   :  { %v1143_v15 = vpop.permute.xlu0 %1142 }
 0x758   :  { %3301 = vrsqrt.f32 %v1131_v11 }
 0x75e   :  { %v3300_v12 = vpop.eup %3299 }
 0x75f   :  { %v1134_v14 = vmul.f32 %v3300_v12, %v1118_v48 }
 0x761   :  { %v1140_v16 = vmul.f32 %v1138_v13, %v1134_v14  ;;  %v3673_v14 = vld [vmem:[%s3872_s5 + $0x4] sm:$0xf] }
 0x762   :  { %v3302_v17 = vpop.eup %3301 }
 0x763   :  { %v1135_v18 = vmul.f32 %v3302_v17, %v1119_v47  ;;  %v1145_v19 = vadd.f32 %v1143_v15, %v1140_v16 }
 0x765   :  { %v1141_v20 = vmul.f32 %v1138_v13, %v1135_v18  ;;  %3038 = vmatprep.mubr.msk.f32.mxu0 %vm183_vm1, %v1145_v19 }
 0x767   :  { %v1146_v21 = vadd.f32 %v1143_v15, %v1141_v20  ;;  %v1380_v15 = vrot.slane %v3673_v14, %v3451_v44 }
 0x769   :  { %3039 = vmatmul.mubr.msk.f32.vlgmr.msra.gmra.mrb[10].mxu0 %vm183_vm1, %v1146_v21 }
 0x76a   :  { %3225 = vmatpush3.bf16.msra.mxu0 %v3222_v55 }
 0x76b   :  { %3227 = vmatprep.subr.bf16.mxu0 %v3226_v58 }
 0x76e   :  { %3229 = vmatpush3.bf16.msra.mxu0 %v3226_v58 }
 0x76f   :  { %3071 = vmatprep.subr.mxu0 %v3344_v1 }
 0x83c   :  { %v3040_v29 = vpop.f32.mrb[10].mxu0 }
 0x83d   :  { %v1233_v30 = vadd.f32 %v3040_v29, %v1154_v28  ;;  %v1227_v31 = vpop.f32.mrb[11].mxu0 }
 0x83e   :  { %v1228_v32 = vadd.f32 %v1227_v31, %v1154_v28 }
 0x83f   :  { %v1237_v34 = vmax.f32 %v1233_v30, 0.0 }
 0x840   :  { %v1236_v33 = vmax.f32 %v1228_v32, 0.0 }
 0x842   :  { %3057 = vmatprep.mubr.msk.f32.mxu1 %vm37_vm0, %v1236_v33 }
 0x843   :  { %3058 = vmatmul.mubr.msk.f32.vlgmr.msra.gmra.mrb[14].mxu1 %vm37_vm0, %v1237_v34 }
 0x844   :  { %3078 = vmatprep.mubr.msk.f32.mxu1 %vm3345_vm2, %v3344_v1 }
 0x916   :  { %v3059_v36 = vpop.f32.mrb[14].mxu1 }
 0x917   :  { %v1332_v43 = vadd.f32 %v3059_v36, %v1252_v35  ;;  %v1326_v37 = vpop.f32.mrb[15].mxu1 }
 0x918   :  { %v1327_v38 = vadd.f32 %v1326_v37, %v1252_v35 }
 0x919   :  { %v1336_v39 = vadd.f32 %v1332_v43, %v1146_v21 }
 0x91a   :  { %v1335_v2 = vadd.f32 %v1327_v38, %v1145_v19 }
 0x91b   :  { %v1340_v40 = vsel %vm183_vm1, %v1336_v39, 0.0 }
 0x91c   :  { %1341 = vadd.xlane.f32.xlu0 %v1340_v40  ;;  %v1337_v41 = vsel %vm183_vm1, %v1335_v2, 0.0 }
 0x91d   :  { %1338 = vadd.xlane.f32.xlu1 %v1337_v41 }
 0x9a9   :  { %v1342_v42 = vpop.xlane.xlu0 %1341 }
 0x9aa   :  { %v1344_v45 = vmul.f32 0.03125, %v1342_v42  ;;  %v1339_v47 = vpop.xlane.xlu1 %1338 }
 0x9ab   :  { %v1343_v48 = vmul.f32 0.03125, %v1339_v47 }
 0x9ac   :  { %v1346_v49 = vsub.f32 %v1336_v39, %v1344_v45 }
 0x9ad   :  { %v1345_v50 = vsub.f32 %v1335_v2, %v1343_v48 }
 0x9ae   :  { %v1348_v0 = vmul.f32 %v1346_v49, %v1346_v49 }
 0x9af   :  { %v1347_v63 = vmul.f32 %v1345_v50, %v1345_v50 }
 0x9b0   :  { %v1352_v51 = vsel %vm183_vm1, %v1348_v0, 0.0 }
 0x9b1   :  { %1353 = vadd.xlane.f32.xlu1 %v1352_v51  ;;  %v1349_v52 = vsel %vm183_vm1, %v1347_v63, 0.0 }
 0x9b2   :  { %1350 = vadd.xlane.f32.xlu0 %v1349_v52 }
 0x9c8   :  { %1365 = vrot.lane.b32.xlu0 %v1249_v26, %s3347_s25 }
 0xa3e   :  { %v1354_v59 = vpop.xlane.xlu1 %1353 }
 0xa3f   :  { %v1356_v60 = vmul.f32 0.03125, %v1354_v59  ;;  %v1351_v61 = vpop.xlane.xlu0 %1350 }
 0xa40   :  { %v1355_v62 = vmul.f32 0.03125, %v1351_v61 }
 0xa41   :  { %v1358_v3 = vadd.f32 1e-05, %v1356_v60 }
 0xa42   :  { %v1357_v4 = vadd.f32 1e-05, %v1355_v62 }
 0xa43   :  { %3303 = vrsqrt.f32 %v1358_v3  ;;  %v1366_v9 = vpop.permute.xlu0 %1365 }
 0xa44   :  { %3305 = vrsqrt.f32 %v1357_v4 }
 0xa4d   :  { %v3304_v5 = vpop.eup %3303 }
 0xa4e   :  { %v3306_v6 = vpop.eup %3305  ;;  %v1362_v7 = vmul.f32 %v3304_v5, %v1346_v49 }
 0xa4f   :  { %v1361_v8 = vmul.f32 %v3306_v6, %v1345_v50 }
 0xa50   :  { %v1364_v10 = vmul.f32 %v1362_v7, %v1249_v26  ;;  %v2812_v7 = vld [vmem:[%s3873_s4 + $0x20] sm:$0xff] }
 0xa51   :  { %v1363_v11 = vmul.f32 %v1361_v8, %v1249_v26  ;;  %v2813_v8 = vld [vmem:[%s3873_s4 + $0x28] sm:$0xff] }
 0xa52   :  { %v3662_v13 = vadd.f32 %v1366_v9, %v1364_v10 }
 0xa53   :  { %v3660_v12 = vadd.f32 %v1366_v9, %v1363_v11 }
 0xa55   :  { %3068 = vmatprep.mubr.msk.f32.mxu0 %vm183_vm1, %v3660_v12 }
 0xa56   :  { %3069 = vmatmul.mubr.msk.f32.vlgmr.msra.gmra.mrb[12].mxu0 %vm183_vm1, %v3662_v13 }
 0xa57   :  { %3073 = vmatprep.mubr.msk.f32.mxu0 %vm3345_vm2, %v3344_v1 }
 0xb29   :  { %v3070_v16 = vpop.f32.mrb[12].mxu0 }
 0xb2a   :  { %v3677_v17 = vadd.f32 %v3070_v16, %v1380_v15  ;;  %v1453_v18 = vpop.f32.mrb[13].mxu0  ;;  %v3230_v16 = vpack.c.bf16 %v2813_v8, %v2812_v7  ;;  %v2828_v7 = vld [vmem:[%s3875_s7 + $0x50] sm:$0xff] }
 0xb2b   :  { %v3679_v19 = vadd.f32 %v1453_v18, %v1380_v15 }
 0xb2c   :  { %1470 = vrot.lane.b32.xlu1 %v3677_v17, %s3347_s25 }
 0xb2d   :  { %1472 = vrot.lane.b32.xlu0 %v3679_v19, %s3346_s24 }
 0xb30   :  { %1468 = vrot.lane.b32.xlu1 %v3679_v19, %s3347_s25 }
 0xb31   :  { %1464 = vrot.lane.b32.xlu0 %v3679_v19, %s3348_s26 }
 0xb34   :  { %1474 = vrot.lane.b32.xlu1 %v3677_v17, %s3346_s24 }
 0xb38   :  { %1466 = vrot.lane.b32.xlu1 %v3677_v17, %s3348_s26 }
 0xb9e   :  { %v1471_v44 = vpop.permute.xlu1 %1470 }
 0xb9f   :  { %3077 = vmatpush3.xpose.msk.msra.mxu1 %vm291_vm3, %v1471_v44  ;;  %v1473_v21 = vpop.permute.xlu0 %1472 }
 0xba0   :  { %3086 = vmatprep.subr.mxu1 %v3344_v1 }
 0xba2   :  { %3079 = vmatmul.mubr.msk.f32.vlgmr.msra.gmra.mrb[16].mxu1 %vm291_vm3, %v3677_v17  ;;  %v1469_v20 = vpop.permute.xlu1 %1468 }
 0xba3   :  { %3072 = vmatpush3.xpose.msk.msra.mxu0 %vm291_vm3, %v1469_v20  ;;  %3088 = vmatprep.mubr.msk.f32.mxu1 %vm3345_vm2, %v3344_v1  ;;  %v1465_v23 = vpop.permute.xlu0 %1464 }
 0xba4   :  { %3081 = vmatprep.subr.mxu0 %v3344_v1 }
 0xba6   :  { %3074 = vmatmul.mubr.msk.f32.vlgmr.msra.gmra.mrb[14].mxu0 %vm291_vm3, %v3679_v19  ;;  %v1475_v22 = vpop.permute.xlu1 %1474 }
 0xba7   :  { %3082 = vmatpush3.xpose.msk.msra.mxu0 %vm291_vm3, %v1473_v21  ;;  %3087 = vmatpush3.xpose.msk.msra.mxu1 %vm291_vm3, %v1475_v22 }
 0xba8   :  { %3083 = vmatprep.mubr.msk.f32.mxu0 %vm3345_vm2, %v3344_v1  ;;  %3091 = vmatprep.subr.mxu0 %v3344_v1 }
 0xba9   :  { %3096 = vmatprep.subr.mxu1 %v3344_v1 }
 0xbaa   :  { %3084 = vmatmul.mubr.msk.f32.vlgmr.msra.gmra.mrb[16].mxu0 %vm291_vm3, %v1465_v23  ;;  %v1467_v24 = vpop.permute.xlu1 %1466  ;;  %v2814_v23 = vld [vmem:[%s3873_s4 + $0x30] sm:$0xff] }
 0xbab   :  { %3089 = vmatmul.mubr.msk.f32.vlgmr.msra.gmra.mrb[18].mxu1 %vm291_vm3, %v1467_v24  ;;  %3093 = vmatprep.mubr.msk.f32.mxu0 %vm3345_vm2, %v3344_v1 }
 0xbac   :  { %3098 = vmatprep.mubr.msk.f32.mxu1 %vm3345_vm2, %v3344_v1 }
 0xc75   :  { %v1632_v26 = vpop.f32.mrb[16].mxu1 }
 0xc76   :  { %v1785_v28 = vmul.f32 0.25, %v1632_v26  ;;  %v3080_v29 = vpop.f32.mrb[17].mxu1 }
 0xc78   :  { %v1791_v30 = vsel %vm592_vm4, %v1785_v28, -inf }
 0xc79   :  { %1792 = vmax.xlane.f32.xlu1 %v1791_v30  ;;  %v1558_v31 = vpop.f32.mrb[14].mxu0 }
 0xc7a   :  { %v1784_v32 = vmul.f32 0.25, %v1558_v31  ;;  %v3075_v33 = vpop.f32.mrb[15].mxu0 }
 0xc7c   :  { %v1788_v34 = vsel %vm592_vm4, %v1784_v32, -inf }
 0xc7d   :  { %1789 = vmax.xlane.f32.xlu0 %v1788_v34  ;;  %v1706_v35 = vpop.f32.mrb[16].mxu0 }
 0xc7e   :  { %v1786_v36 = vmul.f32 0.25, %v1706_v35  ;;  %v3085_v43 = vpop.f32.mrb[17].mxu0  ;;  %v1780_v37 = vpop.f32.mrb[18].mxu1 }
 0xc7f   :  { %v3090_v38 = vpop.f32.mrb[19].mxu1  ;;  %v1787_v39 = vmul.f32 0.25, %v1780_v37  ;;  %v2300_v43 = vrot.slane %v3673_v14, %v3457_v46 }
 0xc80   :  { %v1794_v2 = vsel %vm592_vm4, %v1786_v36, -inf }
 0xc81   :  { %1795 = vmax.xlane.f32.xlu0 %v1794_v2  ;;  %v1797_v40 = vsel %vm592_vm4, %v1787_v39, -inf }
 0xc85   :  { %1798 = vmax.xlane.f32.xlu0 %v1797_v40 }
 0xc8a   :  { %1476 = vrot.lane.b32.xlu1 %v3679_v19, %s3349_s27 }
 0xd06   :  { %v1793_v41 = vpop.xlane.xlu1 %1792 }
 0xd07   :  { %v1801_v42 = vsub.f32 %v1785_v28, %v1793_v41 }
 0xd09   :  { %v1806_v45 = vmul.f32 1.442695, %v1801_v42 }
 0xd0a   :  { %v1790_v47 = vpop.xlane.xlu0 %1789  ;;  %v1477_v48 = vpop.permute.xlu1 %1476 }
 0xd0b   :  { %3307 = vpow2.f32 %v1806_v45  ;;  %v1800_v49 = vsub.f32 %v1784_v32, %v1790_v47  ;;  %3092 = vmatpush3.msra.mxu0 %v1477_v48 }
 0xd0c   :  { %3101 = vmatprep.subr.mxu0 %v3344_v1 }
 0xd0d   :  { %v1804_v50 = vmul.f32 1.442695, %v1800_v49 }
 0xd0e   :  { %v1796_v0 = vpop.xlane.xlu0 %1795 }
 0xd0f   :  { %3309 = vpow2.f32 %v1804_v50  ;;  %v1802_v59 = vsub.f32 %v1786_v36, %v1796_v0 }
 0xd11   :  { %v1808_v60 = vmul.f32 1.442695, %v1802_v59  ;;  %v2820_v59 = vld [vmem:[%s3874_s6 + $0x20] sm:$0xff] }
 0xd12   :  { %v1799_v63 = vpop.xlane.xlu0 %1798 }
 0xd13   :  { %v1803_v51 = vsub.f32 %v1787_v39, %v1799_v63 }
 0xd15   :  { %v3308_v52 = vpop.eup %3307  ;;  %v1810_v53 = vmul.f32 1.442695, %v1803_v51 }
 0xd16   :  { %v1815_v54 = vsel %vm592_vm4, %v3308_v52, 0.0 }
 0xd17   :  { %3311 = vpow2.f32 %v1810_v53  ;;  %1816 = vadd.xlane.f32.xlu0 %v1815_v54 }
 0xd18   :  { %3313 = vpow2.f32 %v1808_v60  ;;  %v2821_v60 = vld [vmem:[%s3874_s6 + $0x28] sm:$0xff] }
 0xd19   :  { %v3310_v55 = vpop.eup %3309 }
 0xd1a   :  { %v1812_v56 = vsel %vm592_vm4, %v3310_v55, 0.0 }
 0xd1b   :  { %1813 = vadd.xlane.f32.xlu1 %v1812_v56 }
 0xd21   :  { %v3312_v57 = vpop.eup %3311 }
 0xd22   :  { %v1821_v58 = vsel %vm592_vm4, %v3312_v57, 0.0  ;;  %v3314_v61 = vpop.eup %3313 }
 0xd23   :  { %1822 = vadd.xlane.f32.xlu0 %v1821_v58  ;;  %v1818_v62 = vsel %vm592_vm4, %v3314_v61, 0.0 }
 0xd2c   :  { %1482 = vrot.lane.b32.xlu1 %v3679_v19, %s3350_s28 }
 0xd39   :  { %1478 = vrot.lane.b32.xlu0 %v3677_v17, %s3349_s27 }
 0xd50   :  { %1819 = vadd.xlane.f32.xlu1 %v1818_v62  ;;  %v2822_v62 = vld [vmem:[%s3874_s6 + $0x30] sm:$0xff] }
 0xd61   :  { %1484 = vrot.lane.b32.xlu1 %v3677_v17, %s3350_s28 }
 0xda4   :  { %v1817_v3 = vpop.xlane.xlu0 %1816 }
 0xda5   :  { %3315 = vrcp.f32 %v1817_v3  ;;  %v2823_v3 = vld [vmem:[%s3874_s6 + $0x38] sm:$0xff] }
 0xda8   :  { %v1814_v4 = vpop.xlane.xlu1 %1813 }
 0xda9   :  { %3317 = vrcp.f32 %v1814_v4  ;;  %v3242_v4 = vpack.c.bf16 %v2823_v3, %v2822_v62  ;;  %v2569_v62 = vld [vmem:[%s3876_s8 + $0x10] sm:$0xff]  ;;  %v2570_v3 = vld [vmem:[%s3876_s8 + $0x18] sm:$0xff] }
 0xdac   :  { %v1483_v17 = vpop.permute.xlu1 %1482 }
 0xdaf   :  { %v3316_v6 = vpop.eup %3315 }
 0xdb0   :  { %v1823_v5 = vpop.xlane.xlu0 %1822  ;;  %v1829_v10 = vmul.f32 %v3316_v6, %v3308_v52  ;;  %v2827_v6 = vld [vmem:[%s3875_s7 + $0x48] sm:$0xff] }
 0xdb1   :  { %3319 = vrcp.f32 %v1823_v5  ;;  %v2826_v5 = vld [vmem:[%s3875_s7 + $0x40] sm:$0xff] }
 0xdb2   :  { %v3246_v8 = vpack.c.bf16 %v2827_v6, %v2826_v5 }
 0xdb3   :  { %v3318_v9 = vpop.eup %3317 }
 0xdb4   :  { %v1828_v11 = vmul.f32 %v3318_v9, %v3310_v55  ;;  %v1479_v15 = vpop.permute.xlu0 %1478  ;;  %v2829_v9 = vld [vmem:[%s3875_s7 + $0x58] sm:$0xff] }
 0xdb5   :  { %3097 = vmatpush3.msra.mxu1 %v1479_v15  ;;  %v2831_v15 = vld [vmem:[%s3875_s7 + $0x68] sm:$0xff] }
 0xdb6   :  { %3094 = vmatmul.mubr.msk.f32.vlgmr.msra.gmra.mrb[18].mxu0 %vm592_vm4, %v1828_v11  ;;  %3099 = vmatmul.mubr.msk.f32.vlgmr.msra.gmra.mrb[20].mxu1 %vm592_vm4, %v1829_v10  ;;  %v3250_v10 = vpack.c.bf16 %v2829_v9, %v2828_v7  ;;  %v2830_v11 = vld [vmem:[%s3875_s7 + $0x60] sm:$0xff] }
 0xdb7   :  { %3102 = vmatpush3.msra.mxu0 %v1483_v17  ;;  %3106 = vmatprep.subr.mxu1 %v3344_v1 }
 0xdb8   :  { %3108 = vmatprep.mubr.msk.f32.mxu1 %vm3345_vm2, %v3344_v1  ;;  %3103 = vmatprep.mubr.msk.f32.mxu0 %vm3345_vm2, %v3344_v1  ;;  %v2815_v1 = vld [vmem:[%s3873_s4 + $0x38] sm:$0xff] }
 0xdb9   :  { %3231 = vmatprep.subr.bf16.mxu0 %v3230_v16  ;;  %v3234_v24 = vpack.c.bf16 %v2815_v1, %v2814_v23 }
 0xdbb   :  { %v3320_v19 = vpop.eup %3319 }
 0xdbc   :  { %v1831_v44 = vmul.f32 %v3320_v19, %v3312_v57 }
 0xddd   :  { %v1820_v18 = vpop.xlane.xlu1 %1819 }
 0xdde   :  { %3321 = vrcp.f32 %v1820_v18 }
 0xde1   :  { %v1485_v20 = vpop.permute.xlu1 %1484 }
 0xde2   :  { %3107 = vmatpush3.msra.mxu1 %v1485_v20 }
 0xde3   :  { %3109 = vmatmul.mubr.msk.f32.vlgmr.msra.gmra.mrb[22].mxu1 %vm592_vm4, %v1831_v44  ;;  %3235 = vmatprep.subr.bf16.mxu1 %v3234_v24 }
 0xde4   :  { %3237 = vmatpush3.bf16.msra.mxu1 %v3234_v24 }
 0xde5   :  { %3247 = vmatprep.subr.bf16.mxu1 %v3246_v8 }
 0xde8   :  { %v3322_v21 = vpop.eup %3321 }
 0xde9   :  { %v1830_v22 = vmul.f32 %v3322_v21, %v3314_v61  ;;  %v3238_v61 = vpack.c.bf16 %v2821_v60, %v2820_v59  ;;  %v2567_v59 = vld [vmem:[%s3876_s8] sm:$0xff]  ;;  %v2568_v60 = vld [vmem:[%s3876_s8 + $0x8] sm:$0xff] }
 0xdeb   :  { %3104 = vmatmul.mubr.msk.f32.vlgmr.msra.gmra.mrb[20].mxu0 %vm592_vm4, %v1830_v22 }
 0xdec   :  { %3233 = vmatpush3.bf16.msra.mxu0 %v3230_v16  ;;  %v3254_v16 = vpack.c.bf16 %v2831_v15, %v2830_v11 }
 0xded   :  { %3239 = vmatprep.subr.bf16.mxu0 %v3238_v61 }
 0xe89   :  { %v1901_v26 = vpop.f32.mrb[18].mxu0  ;;  %v1974_v28 = vpop.f32.mrb[20].mxu1 }
 0xe8a   :  { %v3095_v29 = vpop.f32.mrb[19].mxu0  ;;  %v3100_v30 = vpop.f32.mrb[21].mxu1  ;;  %3115 = vmatprep.mubr.msk.f32.mxu0 %vm291_vm3, %v1901_v26 }
 0xe8b   :  { %3116 = vmatmul.mubr.msk.f32.vlgmr.msra.gmra.mrb[22].mxu0 %vm291_vm3, %v1974_v28 }
 0xe8c   :  { %3241 = vmatpush3.bf16.msra.mxu0 %v3238_v61  ;;  %v3262_v61 = vpack.c.bf16 %v2568_v60, %v2567_v59 }
 0xe8d   :  { %3243 = vmatprep.subr.bf16.mxu0 %v3242_v4 }
 0xe90   :  { %3245 = vmatpush3.bf16.msra.mxu0 %v3242_v4  ;;  %v3266_v4 = vpack.c.bf16 %v2570_v3, %v2569_v62 }
 0xe91   :  { %3263 = vmatprep.subr.bf16.mxu0 %v3262_v61 }
 0xeb6   :  { %v2120_v31 = vpop.f32.mrb[22].mxu1 }
 0xeb7   :  { %v3110_v32 = vpop.f32.mrb[23].mxu1 }
 0xebe   :  { %v2047_v33 = vpop.f32.mrb[20].mxu0 }
 0xebf   :  { %v3105_v34 = vpop.f32.mrb[21].mxu0  ;;  %3122 = vmatprep.mubr.msk.f32.mxu1 %vm291_vm3, %v2047_v33  ;;  %v2832_v33 = vld [vmem:[%s3875_s7 + $0x70] sm:$0xff] }
 0xec0   :  { %3123 = vmatmul.mubr.msk.f32.vlgmr.msra.gmra.mrb[24].mxu1 %vm291_vm3, %v2120_v31  ;;  %v2833_v34 = vld [vmem:[%s3875_s7 + $0x78] sm:$0xff] }
 0xec1   :  { %3249 = vmatpush3.bf16.msra.mxu1 %v3246_v8 }
 0xec2   :  { %3251 = vmatprep.subr.bf16.mxu1 %v3250_v10 }
 0xec5   :  { %3253 = vmatpush3.bf16.msra.mxu1 %v3250_v10 }
 0xec6   :  { %3255 = vmatprep.subr.bf16.mxu1 %v3254_v16 }
 0xec9   :  { %3257 = vmatpush3.bf16.msra.mxu1 %v3254_v16 }
 0xf5e   :  { %v3117_v35 = vpop.f32.mrb[22].mxu0 }
 0xf5f   :  { %v2201_v36 = vpop.f32.mrb[23].mxu0  ;;  %v2294_v38 = vsel %vm183_vm1, %v3117_v35, 0.0  ;;  %v3258_v35 = vpack.c.bf16 %v2833_v34, %v2832_v33 }
 0xf60   :  { %v2291_v40 = vsel %vm183_vm1, %v2201_v36, 0.0  ;;  %v2446_v36 = vrot.slane %v3673_v14, %v3628_v25 }
 0xf61   :  { %3259 = vmatprep.subr.bf16.mxu1 %v3258_v35 }
 0xf62   :  { %3261 = vmatpush3.bf16.msra.mxu1 %v3258_v35 }
 0xf93   :  { %v3124_v37 = vpop.f32.mrb[24].mxu1 }
 0xf94   :  { %v2295_v39 = vsel %vm183_vm1, %v3124_v37, 0.0  ;;  %v2282_v2 = vpop.f32.mrb[25].mxu1 }
 0xf95   :  { %v2296_v41 = vadd.f32 %v2295_v39, %v2294_v38  ;;  %v2292_v42 = vsel %vm183_vm1, %v2282_v2, 0.0 }
 0xf96   :  { %v2293_v45 = vadd.f32 %v2292_v42, %v2291_v40 }
 0xf97   :  { %v2302_v47 = vadd.f32 %v2300_v43, %v2296_v41 }
 0xf98   :  { %v2301_v48 = vadd.f32 %v2300_v43, %v2293_v45 }
 0xf99   :  { %v2304_v49 = vadd.f32 %v2302_v47, %v3662_v13 }
 0xf9a   :  { %v2303_v50 = vadd.f32 %v2301_v48, %v3660_v12 }
 0xf9b   :  { %v2308_v0 = vsel %vm183_vm1, %v2304_v49, 0.0 }
 0xf9c   :  { %2309 = vadd.xlane.f32.xlu1 %v2308_v0  ;;  %v2305_v63 = vsel %vm183_vm1, %v2303_v50, 0.0 }
 0xf9d   :  { %2306 = vadd.xlane.f32.xlu0 %v2305_v63 }
 0xfad   :  { %2332 = vrot.lane.b32.xlu1 %v2300_v43, %s3347_s25 }
 0xfb1   :  { %2448 = vrot.lane.b32.xlu1 %v2446_v36, %s3349_s27 }
0x1029   :  { %v2310_v51 = vpop.xlane.xlu1 %2309 }
0x102a   :  { %v2312_v52 = vmul.f32 0.03125, %v2310_v51  ;;  %v2307_v53 = vpop.xlane.xlu0 %2306 }
0x102b   :  { %v2311_v54 = vmul.f32 0.03125, %v2307_v53 }
0x102c   :  { %v2314_v55 = vsub.f32 %v2304_v49, %v2312_v52 }
0x102d   :  { %v2313_v56 = vsub.f32 %v2303_v50, %v2311_v54  ;;  %v2333_v23 = vpop.permute.xlu1 %2332 }
0x102e   :  { %v2316_v13 = vmul.f32 %v2314_v55, %v2314_v55 }
0x102f   :  { %v2315_v57 = vmul.f32 %v2313_v56, %v2313_v56 }
0x1030   :  { %v2320_v12 = vsel %vm183_vm1, %v2316_v13, 0.0 }
0x1031   :  { %v2317_v58 = vsel %vm183_vm1, %v2315_v57, 0.0  ;;  %v2449_v42 = vpop.permute.xlu1 %2448 }
0x1032   :  { %2318 = vadd.xlane.f32.xlu0 %v2317_v58 }
0x1036   :  { %2321 = vadd.xlane.f32.xlu0 %v2320_v12 }
0x104c   :  { %2337 = vrot.lane.b32.xlu0 %v2300_v43, %s3349_s27  ;;  %v2350_v43 = vrot.slane %v3673_v14, %v3634_v27 }
0x10bf   :  { %v2319_v17 = vpop.xlane.xlu0 %2318 }
0x10c0   :  { %v2323_v18 = vmul.f32 0.03125, %v2319_v17 }
0x10c2   :  { %v2325_v19 = vadd.f32 1e-05, %v2323_v18 }
0x10c3   :  { %v2322_v44 = vpop.xlane.xlu0 %2321 }
0x10c4   :  { %3323 = vrsqrt.f32 %v2325_v19  ;;  %v2324_v20 = vmul.f32 0.03125, %v2322_v44 }
0x10c6   :  { %v2326_v21 = vadd.f32 1e-05, %v2324_v20 }
0x10c7   :  { %v2338_v24 = vpop.permute.xlu0 %2337 }
0x10c8   :  { %3325 = vrsqrt.f32 %v2326_v21 }
0x10ce   :  { %v3324_v22 = vpop.eup %3323 }
0x10cf   :  { %v2329_v1 = vmul.f32 %v3324_v22, %v2313_v56  ;;  %v3343_v22 = vld [vmem:[%s3871_s9] sm:$0xf]  ;;  %s3352_s9 = smov 95  }
0x10d1   :  { %v2335_v26 = vmul.f32 %v2333_v23, %v2329_v1 }
0x10d2   :  { %v3326_v28 = vpop.eup %3325 }
0x10d3   :  { %v2330_v29 = vmul.f32 %v3326_v28, %v2314_v55  ;;  %v2340_v30 = vadd.f32 %v2338_v24, %v2335_v26  ;;  %v2661_v28 = vrot.slane %v3343_v22, %v3628_v25 }
0x10d5   :  { %v2336_v31 = vmul.f32 %v2333_v23, %v2330_v29  ;;  %3133 = vmatprep.mubr.msk.f32.mxu0 %vm183_vm1, %v2340_v30  ;;  %v2574_v23 = vrot.slane %v3343_v22, %v3457_v46  ;;  %v3849_v46 = vrot.slane %v3343_v22, %v3634_v27 }
0x10d7   :  { %v2341_v32 = vadd.f32 %v2338_v24, %v2336_v31 }
0x10d9   :  { %3134 = vmatmul.mubr.msk.f32.vlgmr.msra.gmra.mrb[24].mxu0 %vm183_vm1, %v2341_v32 }
0x10da   :  { %3265 = vmatpush3.bf16.msra.mxu0 %v3262_v61 }
0x10db   :  { %3267 = vmatprep.subr.bf16.mxu0 %v3266_v4 }
0x10de   :  { %3269 = vmatpush3.bf16.msra.mxu0 %v3266_v4 }
0x11ac   :  { %v3135_v37 = vpop.f32.mrb[24].mxu0 }
0x11ad   :  { %v2429_v38 = vadd.f32 %v3135_v37, %v2350_v43  ;;  %v2423_v39 = vpop.f32.mrb[25].mxu0 }
0x11ae   :  { %v2424_v2 = vadd.f32 %v2423_v39, %v2350_v43 }
0x11af   :  { %v2433_v41 = vmax.f32 %v2429_v38, 0.0 }
0x11b0   :  { %v2432_v40 = vmax.f32 %v2424_v2, 0.0 }
0x11b2   :  { %3152 = vmatprep.mubr.msk.f32.mxu1 %vm37_vm0, %v2432_v40 }
0x11b3   :  { %3153 = vmatmul.mubr.msk.f32.vlgmr.msra.gmra.mrb[26].mxu1 %vm37_vm0, %v2433_v41 }
0x1286   :  { %v3154_v45 = vpop.f32.mrb[26].mxu1 }
0x1287   :  { %v2529_v47 = vadd.f32 %v3154_v45, %v2449_v42  ;;  %v2523_v48 = vpop.f32.mrb[27].mxu1 }
0x1288   :  { %v2524_v49 = vadd.f32 %v2523_v48, %v2449_v42 }
0x1289   :  { %v2533_v50 = vadd.f32 %v2529_v47, %v2341_v32 }
0x128a   :  { %v2532_v0 = vadd.f32 %v2524_v49, %v2340_v30 }
0x128b   :  { %v2537_v63 = vsel %vm183_vm1, %v2533_v50, 0.0 }
0x128c   :  { %2538 = vadd.xlane.f32.xlu0 %v2537_v63  ;;  %v2534_v14 = vsel %vm183_vm1, %v2532_v0, 0.0 }
0x128d   :  { %2535 = vadd.xlane.f32.xlu1 %v2534_v14 }
0x1319   :  { %v2539_v51 = vpop.xlane.xlu0 %2538 }
0x131a   :  { %v2541_v52 = vmul.f32 0.03125, %v2539_v51  ;;  %v2536_v53 = vpop.xlane.xlu1 %2535 }
0x131b   :  { %v2540_v54 = vmul.f32 0.03125, %v2536_v53 }
0x131c   :  { %v2543_v55 = vsub.f32 %v2533_v50, %v2541_v52 }
0x131d   :  { %v2542_v56 = vsub.f32 %v2532_v0, %v2540_v54 }
0x131e   :  { %v2545_v57 = vmul.f32 %v2543_v55, %v2543_v55 }
0x131f   :  { %v2544_v58 = vmul.f32 %v2542_v56, %v2542_v56 }
0x1320   :  { %v2549_v13 = vsel %vm183_vm1, %v2545_v57, 0.0 }
0x1321   :  { %2550 = vadd.xlane.f32.xlu1 %v2549_v13  ;;  %v2546_v12 = vsel %vm183_vm1, %v2544_v58, 0.0 }
0x1322   :  { %2547 = vadd.xlane.f32.xlu0 %v2546_v12 }
0x1338   :  { %2562 = vrot.lane.b32.xlu0 %v2446_v36, %s3347_s25 }
0x13ae   :  { %v2551_v5 = vpop.xlane.xlu1 %2550 }
0x13af   :  { %v2553_v6 = vmul.f32 0.03125, %v2551_v5  ;;  %v2548_v7 = vpop.xlane.xlu0 %2547 }
0x13b0   :  { %v2552_v8 = vmul.f32 0.03125, %v2548_v7 }
0x13b1   :  { %v2555_v9 = vadd.f32 1e-05, %v2553_v6 }
0x13b2   :  { %v2554_v10 = vadd.f32 1e-05, %v2552_v8 }
0x13b3   :  { %3327 = vrsqrt.f32 %v2555_v9  ;;  %v2563_v18 = vpop.permute.xlu0 %2562 }
0x13b4   :  { %3329 = vrsqrt.f32 %v2554_v10 }
0x13bd   :  { %v3328_v11 = vpop.eup %3327 }
0x13be   :  { %v3330_v15 = vpop.eup %3329  ;;  %v2559_v16 = vmul.f32 %v3328_v11, %v2543_v55 }
0x13bf   :  { %v2558_v17 = vmul.f32 %v3330_v15, %v2542_v56 }
0x13c0   :  { %v2561_v19 = vmul.f32 %v2559_v16, %v2446_v36 }
0x13c1   :  { %v2560_v44 = vmul.f32 %v2558_v17, %v2446_v36  ;;  %v3351_v36 = vmov 32  }
0x13c2   :  { %v3835_v21 = vadd.f32 %v2563_v18, %v2561_v19  ;;  %3279 = vset.pattern.permute.xlu1 %v3351_v36  ;;  %3280 = vset.pattern.permute.xlu0 %v3351_v36 }
0x13c3   :  { %v3833_v20 = vadd.f32 %v2563_v18, %v2560_v44 }
0x13c5   :  { %3163 = vmatprep.mubr.msk.f32.mxu0 %vm183_vm1, %v3833_v20 }
0x13c6   :  { %3164 = vmatmul.mubr.msk.f32.vlgmr.msra.gmra.mrb[26].mxu0 %vm183_vm1, %v3835_v21 }
0x1499   :  { %v3165_v1 = vpop.f32.mrb[26].mxu0 }
0x149a   :  { %v2653_v24 = vadd.f32 %v3165_v1, %v2574_v23  ;;  %v2647_v26 = vpop.f32.mrb[27].mxu0 }
0x149b   :  { %v2648_v29 = vadd.f32 %v2647_v26, %v2574_v23 }
0x149c   :  { %v2657_v30 = vmax.f32 %v2653_v24, 0.0 }
0x149d   :  { %v2656_v31 = vmax.f32 %v2648_v29, 0.0 }
0x149e   :  { %v2663_v32 = vmul.f32 %v2661_v28, %v2657_v30 }
0x149f   :  { %v2662_v34 = vmul.f32 %v2661_v28, %v2656_v31 }
0x14a0   :  { %v2667_v33 = vsel %vm37_vm0, %v2663_v32, 0.0 }
0x14a1   :  { %2668 = vadd.xlane.f32.xlu1 %v2667_v33  ;;  %v2664_v35 = vsel %vm37_vm0, %v2662_v34, 0.0 }
0x14a5   :  { %2665 = vadd.xlane.f32.xlu1 %v2664_v35 }
0x152e   :  { %v2669_v43 = vpop.xlane.xlu1 %2668 }
0x152f   :  { %v2675_v25 = vadd.f32 %v3849_v46, %v2669_v43 }
0x1531   :  { %v2684_v37 = vsel %vm2676_vm5, %v2675_v25, -inf }
0x1532   :  { %v2685_v38 = vrot.slane %v2684_v37, 4  ;;  %v2666_v39 = vpop.xlane.xlu1 %2665 }
0x1533   :  { %v2674_v2 = vadd.f32 %v3849_v46, %v2666_v39 }
0x1534   :  { %v2686_v40 = vmax.f32 %v2684_v37, %v2685_v38 }
0x1535   :  { %v2677_v41 = vsel %vm2676_vm5, %v2674_v2, -inf }
0x1536   :  { %v2687_v42 = vrot.slane %v2686_v40, 2  ;;  %v2678_v45 = vrot.slane %v2677_v41, 4 }
0x1538   :  { %v2688_v47 = vmax.f32 %v2686_v40, %v2687_v42  ;;  %v2679_v48 = vmax.f32 %v2677_v41, %v2678_v45 }
0x153a   :  { %v2689_v49 = vrot.slane %v2688_v47, 1  ;;  %v2680_v27 = vrot.slane %v2679_v48, 2 }
0x153c   :  { %v2690_v50 = vmax.f32 %v2688_v47, %v2689_v49  ;;  %v2681_v0 = vmax.f32 %v2679_v48, %v2680_v27 }
0x153e   :  { %v2692_v63 = vsub.f32 %v2675_v25, %v2690_v50  ;;  %v2682_v14 = vrot.slane %v2681_v0, 1 }
0x1540   :  { %v2695_v51 = vmul.f32 1.442695, %v2692_v63  ;;  %v2683_v52 = vmax.f32 %v2681_v0, %v2682_v14 }
0x1542   :  { %3331 = vpow2.f32 %v2695_v51  ;;  %v2691_v53 = vsub.f32 %v2674_v2, %v2683_v52 }
0x1544   :  { %v2693_v54 = vmul.f32 1.442695, %v2691_v53 }
0x1546   :  { %3333 = vpow2.f32 %v2693_v54 }
0x154c   :  { %v3332_v55 = vpop.eup %3331 }
0x154d   :  { %v2704_v56 = vsel %vm2676_vm5, %v3332_v55, 0.0 }
0x154e   :  { %v2705_v57 = vrot.slane %v2704_v56, 4 }
0x1550   :  { %v3334_v58 = vpop.eup %3333  ;;  %v2706_v13 = vadd.f32 %v2705_v57, %v2704_v56 }
0x1551   :  { %v2697_v12 = vsel %vm2676_vm5, %v3334_v58, 0.0 }
0x1552   :  { %v2707_v59 = vrot.slane %v2706_v13, 2  ;;  %v2698_v60 = vrot.slane %v2697_v12, 4 }
0x1554   :  { %v2708_v61 = vadd.f32 %v2707_v59, %v2706_v13  ;;  %v2699_v62 = vadd.f32 %v2698_v60, %v2697_v12 }
0x1556   :  { %v2709_v3 = vrot.slane %v2708_v61, 1  ;;  %v2700_v4 = vrot.slane %v2699_v62, 2 }
0x1558   :  { %v2710_v5 = vadd.f32 %v2709_v3, %v2708_v61  ;;  %v2701_v6 = vadd.f32 %v2700_v4, %v2699_v62 }
0x155a   :  { %3335 = vrcp.f32 %v2710_v5  ;;  %v2702_v7 = vrot.slane %v2701_v6, 1 }
0x155c   :  { %v2703_v8 = vadd.f32 %v2702_v7, %v2701_v6 }
0x155e   :  { %3337 = vrcp.f32 %v2703_v8 }
0x1564   :  { %v3336_v9 = vpop.eup %3335 }
0x1565   :  { %v2714_v10 = vmul.f32 %v3336_v9, %v3332_v55 }
0x1567   :  { %2722 = vperm.xlu1 %3279, %v2714_v10  }
0x1568   :  { %v3338_v11 = vpop.eup %3337 }
0x1569   :  { %v2713_v15 = vmul.f32 %v3338_v11, %v3334_v58 }
0x156b   :  { %2717 = vperm.xlu0 %3280, %v2713_v15  }
0x15e6   :  { %v2723_v16 = vpop.permute.xlu1 %2722 }
0x15e7   :  { %v2726_v17 = vmul.f32 %v2723_v16, %v3835_v21 }
0x15e9   :  { %v2734_v18 = vsel %vm183_vm1, %v2726_v17, 0.0 }
0x15ea   :  { %v2735_v19 = vrot.slane %v2734_v18, 4  ;;  %v2718_v44 = vpop.permute.xlu0 %2717 }
0x15eb   :  { %v2725_v22 = vmul.f32 %v2718_v44, %v3833_v20 }
0x15ec   :  { %v2736_v23 = vadd.f32 %v2735_v19, %v2734_v18 }
0x15ed   :  { %v2727_v1 = vsel %vm183_vm1, %v2725_v22, 0.0 }
0x15ee   :  { %v2737_v24 = vrot.slane %v2736_v23, 2  ;;  %v2728_v26 = vrot.slane %v2727_v1, 4 }
0x15f0   :  { %v2738_v28 = vadd.f32 %v2737_v24, %v2736_v23  ;;  %v2729_v29 = vadd.f32 %v2728_v26, %v2727_v1 }
0x15f2   :  { %v2739_v30 = vrot.slane %v2738_v28, 1  ;;  %v2730_v31 = vrot.slane %v2729_v29, 2 }
0x15f4   :  { %v2740_v32 = vadd.f32 %v2739_v30, %v2738_v28  ;;  %v2731_v33 = vadd.f32 %v2730_v31, %v2729_v29 }
0x15f6   :  { %v2732_v34 = vrot.slane %v2731_v33, 1  ;;  %v2742_v21 = vmul.f32 %v2740_v32, %v3849_v46 }
0x15f8   :  { %v2733_v35 = vadd.f32 %v2732_v34, %v2731_v33  ;;  %v2745_v43 = vrot.slane %v2742_v21, 7 }
0x15fa   :  { %v2741_v36 = vmul.f32 %v2733_v35, %v3849_v46 }
0x15fc   :  { %v2747_v20 = vsel %vm2746_vm6, %v2745_v43, %v2741_v36 }
0x15fd   :  { %v2750_v25 = vsel %vm2749_vm7, %v2747_v20, 0.0 }
0x15fe   :  { %2751 = vadd.xlane.f32.xlu1 %v2750_v25 }
0x168b   :  { %v2752_v37 = vpop.xlane.xlu1 %2751 }
0x168c   :  { %v2753_v38 = vadd.f32 %v2752_v37, %v3849_v46 }
0x168e   :  { %v2754_v39 = vsub.f32 0.0, %v2753_v38 }
0x1690   :  { %v2755_v2 = vmul.f32 1.442695, %v2754_v39 }
0x1692   :  { %3339 = vpow2.f32 %v2755_v2 }
0x169c   :  { %v3340_v40 = vpop.eup %3339 }
0x169d   :  { %v2757_v41 = vadd.f32 1.0, %v3340_v40 }
0x169f   :  { %3341 = vrcp.f32 %v2757_v41 }
0x16a9   :  { %v3342_v42 = vpop.eup %3341 }
0x16aa   :  { %2760 = vrot.lane.b32.xlu0 %v3342_v42, %s3352_s9 }
0x171c   :  { %v2761_v45 = vpop.permute.xlu0 %2760 }
0x171d   :  { %2764 = vst.msk [vmem:[%s3877_s10] sm:$0x3] %vm2763_vm8, %v2761_v45 }

</bundles_post_ra>
